<compile_context>
chip_gen: v7x
topology: tpu7x:2x2x1
jax: 0.10.0
libtpu: 0.0.40
codegen_flags: <defaults>
</compile_context>

<pallas_src>
import jax
import jax.numpy as jnp
from jax.experimental import pallas as pl
from jax.experimental.pallas import tpu as pltpu


D_EMB = 64    # theta-embedding MLP width
D_HID = 128   # phase sub-net hidden width


# ----------------------------------------------------------------------------
# Pallas kernel: one batch-tile (batch along lanes) of the full forward pass
# ----------------------------------------------------------------------------
def phasednn_kernel(xin_ref, w8_ref, w64_ref, w128_ref, cols_ref, out_ref):
    f32 = jnp.float32
    mm_dtype = w128_ref.dtype          # f32 (exact path) or bf16 (fast path)

    # ---- fused input: row 0 = t, rows 1..6 = theta, row 7 = 0 ---------------
    xin = xin_ref[...]                 # (8, tile_b) f32
    t_row = xin[0:1, :]                # (1, tile_b), VPU only
    xin_mm = xin.astype(mm_dtype)

    # ---- packed column vectors (always f32, used on the VPU) ----------------
    cols = cols_ref[...]               # (128, 8)
    be1 = cols[0:D_EMB, 0:1]           # (64, 1)  embed bias 1
    be2 = cols[0:D_EMB, 1:2]           # (64, 1)  embed bias 2
    bp5 = cols[D_EMB:D_EMB + 1, 0:1]   # (1, 1)   output bias (stashed scalar)
    wp1t = cols[:, 2:3]                # (128, 1) t-column of phase layer 1
    b1 = cols[:, 3:4]                  # (128, 1) folded bias of phase layer 1
    b2 = cols[:, 4:5]
    b3 = cols[:, 5:6]
    b4 = cols[:, 6:7]
    wp5 = cols[:, 7:8]                 # (128, 1) output-layer weight column

    # ---- weight stacks: static, sublane-aligned slices of resident blocks ---
    we2t = w64_ref[0:D_EMB, :]                 # (64, 64)
    wfold = w64_ref[D_EMB:D_EMB + D_HID, :]    # (128, 64) = (we3 @ wp1_emb)^T
    wp2t = w128_ref[0:D_HID, :]                # (128, 128)
    wp3t = w128_ref[D_HID:2 * D_HID, :]
    wp4t = w128_ref[2 * D_HID:3 * D_HID, :]

    # ---- theta embedding MLP: 6(->8 padded) -> 64 -> 64 (ReLU, ReLU) --------
    # w8 has zero columns for the t row and the pad row, so they do not leak.
    h = jnp.dot(w8_ref[...], xin_mm, preferred_element_type=f32) + be1
    h = jnp.maximum(h, 0.0)
    h = jnp.dot(we2t, h.astype(mm_dtype), preferred_element_type=f32) + be2
    h = jnp.maximum(h, 0.0)

    # ---- phase layer 1, with the linear 3rd embed layer folded in -----------
    # t contribution: (128,1)*(1,tile_b) broadcast-multiply on the VPU.
    x = (jnp.dot(wfold, h.astype(mm_dtype), preferred_element_type=f32)
         + wp1t * t_row + b1)
    x = jnp.maximum(x, 0.0)
    x = jnp.dot(wp2t, x.astype(mm_dtype), preferred_element_type=f32) + b2
    x = jnp.maximum(x, 0.0)
    x = jnp.dot(wp3t, x.astype(mm_dtype), preferred_element_type=f32) + b3
    x = jnp.maximum(x, 0.0)
    x = jnp.dot(wp4t, x.astype(mm_dtype), preferred_element_type=f32) + b4
    x = jnp.maximum(x, 0.0)            # (128, tile_b)

    # ---- output layer 128 -> 1: VPU multiply + sublane reduce (off the MXU);
    #      result is already lane-dense (1, tile_b) -> unmasked full-lane vst.
    out_ref[...] = jnp.sum(x * wp5, axis=0, keepdims=True) + bp5


# ----------------------------------------------------------------------------
# Weight preprocessing: transpose, fold, and pack into 4 resident operands
# ----------------------------------------------------------------------------
def _prep_weights(params, n_theta, use_bf16):
    (we1, be1, we2, be2, we3, be3,
     wp1, bp1, wp2, bp2, wp3, bp3, wp4, bp4, wp5, bp5) = params
    f32 = jnp.float32
    hi = jax.lax.Precision.HIGHEST

    assert we1.shape[1] == D_EMB and wp2.shape[0] == D_HID and D_EMB < D_HID

    # First embed layer, transposed and padded to K=8 (col 0 = t slot, col 7 = pad).
    w8 = jnp.zeros((D_EMB, 8), f32).at[:, 1:1 + n_theta].set(we1.T)

    # Fold the linear third embed layer into phase layer 1 (exact algebra):
    #   x1 = t*wp1_t + (h2@we3 + be3)@wp1_e + bp1
    #      = t*wp1_t + h2 @ (we3@wp1_e) + (be3@wp1_e + bp1)
    wp1_t = wp1[0:1, :]                                     # (1, 128)
    wp1_e = wp1[1:, :]                                      # (64, 128)
    wfold = jnp.dot(we3, wp1_e, precision=hi).T             # (128, 64)
    bfold = (jnp.dot(be3, wp1_e, precision=hi) + bp1).T     # (128, 1)

    # K=64 stack: [we2^T ; wfold] -> (192, 64); K=128 stack -> (384, 128).
    w64 = jnp.concatenate([we2.T, wfold], axis=0)
    w128 = jnp.concatenate([wp2.T, wp3.T, wp4.T], axis=0)

    # Column pack (stays f32, consumed on the VPU): (128, 8)
    #   col 0: rows 0:64 = be1^T, row 64 = bp5 (stashed scalar)
    #   col 1: rows 0:64 = be2^T
    #   col 2: wp1_t^T   col 3: bfold   cols 4..6: bp2..bp4^T   col 7: wp5
    cols = jnp.zeros((D_HID, 8), f32)
    cols = cols.at[0:D_EMB, 0:1].set(be1.T)
    cols = cols.at[D_EMB, 0].set(bp5[0, 0])
    cols = cols.at[0:D_EMB, 1:2].set(be2.T)
    cols = cols.at[:, 2:3].set(wp1_t.T)
    cols = cols.at[:, 3:4].set(bfold)
    cols = cols.at[:, 4:5].set(bp2.T)
    cols = cols.at[:, 5:6].set(bp3.T)
    cols = cols.at[:, 6:7].set(bp4.T)
    cols = cols.at[:, 7:8].set(wp5)

    mm_dtype = jnp.bfloat16 if use_bf16 else f32
    return (w8.astype(mm_dtype), w64.astype(mm_dtype),
            w128.astype(mm_dtype), cols)


# ----------------------------------------------------------------------------
# Wrapper
# ----------------------------------------------------------------------------
def phasednn_forward(t_norm, theta, params, *, tile_b=None, use_bf16=False):
    B = t_norm.shape[0]
    n_theta = theta.shape[1]
    assert n_theta <= 7, "fused input packs t + theta into 8 rows"

    if tile_b is None:
        # Large tiles amortize the ~0.35us/step pipeline overhead and the xin
        # DMA; keep a multiple of 256 (fills v6e/v7x MXU lanes, also a multiple
        # of 128 for v5e), cap at 2048, and aim for >=4 grid steps at large B
        # so the grid axis still shards across v7x's two TensorCores.
        tile_b = min(2048, max(256, 256 * pl.cdiv(pl.cdiv(B, 4), 256)))

    num_tiles = pl.cdiv(B, tile_b)
    B_pad = num_tiles * tile_b

    # Fused, transposed, zero-padded input: (8, B_pad), one DMA per grid step.
    xin = jnp.zeros((8, B_pad), jnp.float32)
    xin = xin.at[0, :B].set(t_norm[:, 0])
    xin = xin.at[1:1 + n_theta, :B].set(theta.T)

    w8, w64, w128, cols = _prep_weights(params, n_theta, use_bf16)

    in_specs = [pl.BlockSpec((8, tile_b), lambda i: (0, i))]
    # Full-array blocks with constant index maps: weights stay resident, no
    # per-step re-fetch.  Total VMEM (weights + activations) << scoped limit.
    in_specs += [pl.BlockSpec(w.shape, lambda i: (0, 0))
                 for w in (w8, w64, w128, cols)]

    out = pl.pallas_call(
        phasednn_kernel,
        out_shape=jax.ShapeDtypeStruct((1, B_pad), jnp.float32),
        grid_spec=pltpu.PrefetchScalarGridSpec(
            num_scalar_prefetch=0,
            grid=(num_tiles,),
            in_specs=in_specs,
            out_specs=pl.BlockSpec((1, tile_b), lambda i: (0, i)),
        ),
        compiler_params=pltpu.CompilerParams(
            dimension_semantics=("parallel",),   # shard batch tiles across TCs
        ),
    )(xin, w8, w64, w128, cols)

    return out[0, :B].reshape(B, 1)


# ----------------------------------------------------------------------------
# Deterministic parameter init (PyTorch nn.Linear style: U(-1/sqrt(fan_in), +))
# ----------------------------------------------------------------------------
def init_linear(key, in_dim, out_dim):
    kw, kb = jax.random.split(key)
    bound = 1.0 / jnp.sqrt(in_dim)
    w = jax.random.uniform(kw, (in_dim, out_dim), jnp.float32, -bound, bound)
    b = jax.random.uniform(kb, (1, out_dim), jnp.float32, -bound, bound)
    return w, b


def init_params(key):
    keys = jax.random.split(key, 8)
    # theta embedding MLP: 6 -> 64 -> 64 -> 64
    we1, be1 = init_linear(keys[0], 6, D_EMB)
    we2, be2 = init_linear(keys[1], D_EMB, D_EMB)
    we3, be3 = init_linear(keys[2], D_EMB, D_EMB)
    # phase sub-net: 65 -> 128 -> 128 -> 128 -> 128 -> 1
    wp1, bp1 = init_linear(keys[3], 1 + D_EMB, D_HID)
    wp2, bp2 = init_linear(keys[4], D_HID, D_HID)
    wp3, bp3 = init_linear(keys[5], D_HID, D_HID)
    wp4, bp4 = init_linear(keys[6], D_HID, D_HID)
    wp5, bp5 = init_linear(keys[7], D_HID, 1)
    return (we1, be1, we2, be2, we3, be3,
            wp1, bp1, wp2, bp2, wp3, bp3, wp4, bp4, wp5, bp5)


# Pure-JAX reference (untransposed, mirrors the PyTorch module) for correctness.
def phasednn_ref(t_norm, theta, params):
    (we1, be1, we2, be2, we3, be3,
     wp1, bp1, wp2, bp2, wp3, bp3, wp4, bp4, wp5, bp5) = params
    h = jnp.maximum(theta @ we1 + be1, 0.0)
    h = jnp.maximum(h @ we2 + be2, 0.0)
    emb = h @ we3 + be3
    x = jnp.concatenate([t_norm, emb], axis=-1)
    x = jnp.maximum(x @ wp1 + bp1, 0.0)
    x = jnp.maximum(x @ wp2 + bp2, 0.0)
    x = jnp.maximum(x @ wp3 + bp3, 0.0)
    x = jnp.maximum(x @ wp4 + bp4, 0.0)
    return x @ wp5 + bp5


if __name__ == "__main__":
    key = jax.random.PRNGKey(0)
    k_data, k_params = jax.random.split(key)
    params = init_params(k_params)

    # (batch, bf16 fast path, tolerance):
    #  - B=8   : single padded tile, exact-ish f32 path
    #  - B=500 : two 256-wide tiles (padding + megacore split), f32 path
    #  - B=1500: adaptive tile_b=512, three tiles, bf16 MXU fast path
    cases = [(8, False, 5e-3), (500, False, 5e-3), (1500, True, 5e-2)]
    for B, use_bf16, tol in cases:
        kt, kth = jax.random.split(jax.random.fold_in(k_data, B))
        t_norm = jax.random.uniform(kt, (B, 1), jnp.float32, -1.0, 1.0)
        theta = jax.random.normal(kth, (B, 6), jnp.float32)

        out = jax.block_until_ready(
            phasednn_forward(t_norm, theta, params, use_bf16=use_bf16))
        ref = phasednn_ref(t_norm, theta, params)

        assert out.shape == (B, 1)
        assert jnp.allclose(out, ref, atol=tol, rtol=tol), (
            f"mismatch vs reference at B={B}, use_bf16={use_bf16}")

    print("KERNEL_OK")
</pallas_src>

<mosaic_0001>
module attributes {stable_mosaic.version = 11 : i64} {
  func.func @phasednn_kernel(%arg0: i32, %arg1: memref<8x256xf32, #tpu.memory_space<vmem>>, %arg2: memref<64x8xf32, #tpu.memory_space<vmem>>, %arg3: memref<192x64xf32, #tpu.memory_space<vmem>>, %arg4: memref<384x128xf32, #tpu.memory_space<vmem>>, %arg5: memref<128x8xf32, #tpu.memory_space<vmem>>, %arg6: memref<1x256xf32, #tpu.memory_space<vmem>>) attributes {dimension_semantics = [#tpu.dimension_semantics<parallel>], iteration_bounds = array<i64: 1>, scalar_prefetch = 0 : i64, scratch_operands = 0 : i64, tpu.core_type = #tpu.core_type<tc>, window_params = [{transform_indices = @transform_0, window_bounds = array<i64: 8, 256>}, {pipeline_mode = #tpu.pipeline_mode<synchronous>, transform_indices = @transform_1, window_bounds = array<i64: 64, 8>}, {pipeline_mode = #tpu.pipeline_mode<synchronous>, transform_indices = @transform_2, window_bounds = array<i64: 192, 64>}, {pipeline_mode = #tpu.pipeline_mode<synchronous>, transform_indices = @transform_3, window_bounds = array<i64: 384, 128>}, {pipeline_mode = #tpu.pipeline_mode<synchronous>, transform_indices = @transform_4, window_bounds = array<i64: 128, 8>}, {transform_indices = @transform_5, window_bounds = array<i64: 1, 256>}]} {
    %c0 = arith.constant 0 : index
    %c0_0 = arith.constant 0 : index
    %0 = vector.load %arg1[%c0, %c0_0] : memref<8x256xf32, #tpu.memory_space<vmem>>, vector<8x256xf32>
    %1 = vector.extract_strided_slice %0 {offsets = [0, 0], sizes = [1, 256], strides = [1, 1]} : vector<8x256xf32> to vector<1x256xf32>
    %c0_1 = arith.constant 0 : index
    %c0_2 = arith.constant 0 : index
    %2 = vector.load %arg5[%c0_1, %c0_2] : memref<128x8xf32, #tpu.memory_space<vmem>>, vector<128x8xf32>
    %3 = vector.extract_strided_slice %2 {offsets = [0, 0], sizes = [64, 1], strides = [1, 1]} : vector<128x8xf32> to vector<64x1xf32>
    %4 = vector.extract_strided_slice %2 {offsets = [0, 1], sizes = [64, 1], strides = [1, 1]} : vector<128x8xf32> to vector<64x1xf32>
    %5 = vector.extract_strided_slice %2 {offsets = [64, 0], sizes = [1, 1], strides = [1, 1]} : vector<128x8xf32> to vector<1x1xf32>
    %6 = vector.extract_strided_slice %2 {offsets = [0, 2], sizes = [128, 1], strides = [1, 1]} : vector<128x8xf32> to vector<128x1xf32>
    %7 = vector.extract_strided_slice %2 {offsets = [0, 3], sizes = [128, 1], strides = [1, 1]} : vector<128x8xf32> to vector<128x1xf32>
    %8 = vector.extract_strided_slice %2 {offsets = [0, 4], sizes = [128, 1], strides = [1, 1]} : vector<128x8xf32> to vector<128x1xf32>
    %9 = vector.extract_strided_slice %2 {offsets = [0, 5], sizes = [128, 1], strides = [1, 1]} : vector<128x8xf32> to vector<128x1xf32>
    %10 = vector.extract_strided_slice %2 {offsets = [0, 6], sizes = [128, 1], strides = [1, 1]} : vector<128x8xf32> to vector<128x1xf32>
    %11 = vector.extract_strided_slice %2 {offsets = [0, 7], sizes = [128, 1], strides = [1, 1]} : vector<128x8xf32> to vector<128x1xf32>
    %c0_3 = arith.constant 0 : index
    %c0_4 = arith.constant 0 : index
    %12 = vector.load %arg3[%c0_3, %c0_4] : memref<192x64xf32, #tpu.memory_space<vmem>>, vector<64x64xf32>
    %c64 = arith.constant 64 : index
    %c0_5 = arith.constant 0 : index
    %13 = vector.load %arg3[%c64, %c0_5] : memref<192x64xf32, #tpu.memory_space<vmem>>, vector<128x64xf32>
    %c0_6 = arith.constant 0 : index
    %c0_7 = arith.constant 0 : index
    %14 = vector.load %arg4[%c0_6, %c0_7] : memref<384x128xf32, #tpu.memory_space<vmem>>, vector<128x128xf32>
    %c128 = arith.constant 128 : index
    %c0_8 = arith.constant 0 : index
    %15 = vector.load %arg4[%c128, %c0_8] : memref<384x128xf32, #tpu.memory_space<vmem>>, vector<128x128xf32>
    %c256 = arith.constant 256 : index
    %c0_9 = arith.constant 0 : index
    %16 = vector.load %arg4[%c256, %c0_9] : memref<384x128xf32, #tpu.memory_space<vmem>>, vector<128x128xf32>
    %c0_10 = arith.constant 0 : index
    %c0_11 = arith.constant 0 : index
    %17 = vector.load %arg2[%c0_10, %c0_11] : memref<64x8xf32, #tpu.memory_space<vmem>>, vector<64x8xf32>
    %cst = arith.constant dense<0.000000e+00> : vector<64x256xf32>
    %18 = tpu.matmul %17, %0, %cst {dimension_numbers = #tpu.dot_dimension_numbers<[1], [0], [0], [1], [0, 0, 1, 1], [], []>} : vector<64x8xf32>, vector<8x256xf32>, vector<64x256xf32> -> vector<64x256xf32>
    %19 = vector.broadcast %3 : vector<64x1xf32> to vector<64x256xf32>
    %20 = arith.addf %18, %19 : vector<64x256xf32>
    %cst_12 = arith.constant 0.000000e+00 : f32
    %21 = vector.broadcast %cst_12 : f32 to vector<64x256xf32>
    %22 = arith.maximumf %20, %21 : vector<64x256xf32>
    %cst_13 = arith.constant dense<0.000000e+00> : vector<64x256xf32>
    %23 = tpu.matmul %12, %22, %cst_13 {dimension_numbers = #tpu.dot_dimension_numbers<[1], [0], [0], [1], [0, 0, 1, 1], [], []>} : vector<64x64xf32>, vector<64x256xf32>, vector<64x256xf32> -> vector<64x256xf32>
    %24 = vector.broadcast %4 : vector<64x1xf32> to vector<64x256xf32>
    %25 = arith.addf %23, %24 : vector<64x256xf32>
    %cst_14 = arith.constant 0.000000e+00 : f32
    %26 = vector.broadcast %cst_14 : f32 to vector<64x256xf32>
    %27 = arith.maximumf %25, %26 : vector<64x256xf32>
    %cst_15 = arith.constant dense<0.000000e+00> : vector<128x256xf32>
    %28 = tpu.matmul %13, %27, %cst_15 {dimension_numbers = #tpu.dot_dimension_numbers<[1], [0], [0], [1], [0, 0, 1, 1], [], []>} : vector<128x64xf32>, vector<64x256xf32>, vector<128x256xf32> -> vector<128x256xf32>
    %29 = vector.broadcast %6 : vector<128x1xf32> to vector<128x256xf32>
    %30 = vector.broadcast %1 : vector<1x256xf32> to vector<128x256xf32>
    %31 = arith.mulf %29, %30 : vector<128x256xf32>
    %32 = arith.addf %28, %31 : vector<128x256xf32>
    %33 = vector.broadcast %7 : vector<128x1xf32> to vector<128x256xf32>
    %34 = arith.addf %32, %33 : vector<128x256xf32>
    %cst_16 = arith.constant 0.000000e+00 : f32
    %35 = vector.broadcast %cst_16 : f32 to vector<128x256xf32>
    %36 = arith.maximumf %34, %35 : vector<128x256xf32>
    %cst_17 = arith.constant dense<0.000000e+00> : vector<128x256xf32>
    %37 = tpu.matmul %14, %36, %cst_17 {dimension_numbers = #tpu.dot_dimension_numbers<[1], [0], [0], [1], [0, 0, 1, 1], [], []>} : vector<128x128xf32>, vector<128x256xf32>, vector<128x256xf32> -> vector<128x256xf32>
    %38 = vector.broadcast %8 : vector<128x1xf32> to vector<128x256xf32>
    %39 = arith.addf %37, %38 : vector<128x256xf32>
    %cst_18 = arith.constant 0.000000e+00 : f32
    %40 = vector.broadcast %cst_18 : f32 to vector<128x256xf32>
    %41 = arith.maximumf %39, %40 : vector<128x256xf32>
    %cst_19 = arith.constant dense<0.000000e+00> : vector<128x256xf32>
    %42 = tpu.matmul %15, %41, %cst_19 {dimension_numbers = #tpu.dot_dimension_numbers<[1], [0], [0], [1], [0, 0, 1, 1], [], []>} : vector<128x128xf32>, vector<128x256xf32>, vector<128x256xf32> -> vector<128x256xf32>
    %43 = vector.broadcast %9 : vector<128x1xf32> to vector<128x256xf32>
    %44 = arith.addf %42, %43 : vector<128x256xf32>
    %cst_20 = arith.constant 0.000000e+00 : f32
    %45 = vector.broadcast %cst_20 : f32 to vector<128x256xf32>
    %46 = arith.maximumf %44, %45 : vector<128x256xf32>
    %cst_21 = arith.constant dense<0.000000e+00> : vector<128x256xf32>
    %47 = tpu.matmul %16, %46, %cst_21 {dimension_numbers = #tpu.dot_dimension_numbers<[1], [0], [0], [1], [0, 0, 1, 1], [], []>} : vector<128x128xf32>, vector<128x256xf32>, vector<128x256xf32> -> vector<128x256xf32>
    %48 = vector.broadcast %10 : vector<128x1xf32> to vector<128x256xf32>
    %49 = arith.addf %47, %48 : vector<128x256xf32>
    %cst_22 = arith.constant 0.000000e+00 : f32
    %50 = vector.broadcast %cst_22 : f32 to vector<128x256xf32>
    %51 = arith.maximumf %49, %50 : vector<128x256xf32>
    %52 = vector.broadcast %11 : vector<128x1xf32> to vector<128x256xf32>
    %53 = arith.mulf %51, %52 : vector<128x256xf32>
    %cst_23 = arith.constant dense<0.000000e+00> : vector<256xf32>
    %54 = vector.multi_reduction <add>, %53, %cst_23 [0] : vector<128x256xf32> to vector<256xf32>
    %55 = vector.shape_cast %54 : vector<256xf32> to vector<1x256xf32>
    %56 = vector.broadcast %5 : vector<1x1xf32> to vector<1x256xf32>
    %57 = arith.addf %55, %56 : vector<1x256xf32>
    %c0_24 = arith.constant 0 : index
    %c0_25 = arith.constant 0 : index
    %58 = vector.load %arg6[%c0_24, %c0_25] : memref<1x256xf32, #tpu.memory_space<vmem>>, vector<1x256xf32>
    tpu.vector_store %arg6[%c0_24, %c0_25], %57 {strides = array<i32>} : memref<1x256xf32, #tpu.memory_space<vmem>>, vector<1x256xf32>,
    return
  }
  func.func @transform_0(%arg0: i32) -> (i32, i32) {
    %c0_i32 = arith.constant 0 : i32
    %c0_i32_0 = arith.constant 0 : i32
    return %c0_i32, %arg0 : i32, i32
  }
  func.func @transform_1(%arg0: i32) -> (i32, i32) {
    %c0_i32 = arith.constant 0 : i32
    %c0_i32_0 = arith.constant 0 : i32
    %c0_i32_1 = arith.constant 0 : i32
    return %c0_i32, %c0_i32_0 : i32, i32
  }
  func.func @transform_2(%arg0: i32) -> (i32, i32) {
    %c0_i32 = arith.constant 0 : i32
    %c0_i32_0 = arith.constant 0 : i32
    %c0_i32_1 = arith.constant 0 : i32
    return %c0_i32, %c0_i32_0 : i32, i32
  }
  func.func @transform_3(%arg0: i32) -> (i32, i32) {
    %c0_i32 = arith.constant 0 : i32
    %c0_i32_0 = arith.constant 0 : i32
    %c0_i32_1 = arith.constant 0 : i32
    return %c0_i32, %c0_i32_0 : i32, i32
  }
  func.func @transform_4(%arg0: i32) -> (i32, i32) {
    %c0_i32 = arith.constant 0 : i32
    %c0_i32_0 = arith.constant 0 : i32
    %c0_i32_1 = arith.constant 0 : i32
    return %c0_i32, %c0_i32_0 : i32, i32
  }
  func.func @transform_5(%arg0: i32) -> (i32, i32) {
    %c0_i32 = arith.constant 0 : i32
    %c0_i32_0 = arith.constant 0 : i32
    return %c0_i32, %arg0 : i32, i32
  }
}

</mosaic_0001>

<bundles_post_ra>
// kernel: tpu_custom_call.1
= control target key start
LH: loop header
LB: loop body
LE: loop exit
PB: predicated region body
PF: predicated region fallthrough
CT: control target
= control target key end

     0   :  { %vm159_vm0 = vcmask 64512   ;;  %v2160_v3 = vmov 0.0   ;;  %v2161_v4 = vmov 0   ;;  %s2946_s0 = inlined_call_operand.vmem [shape: f32[8,256], index: 0, kind: input, shape index: {}]   ;;  %s2947_s1 = inlined_call_operand.vmem [shape: f32[64,8], index: 1, kind: input, shape index: {}]   ;;  %s2948_s2 = inlined_call_operand.vmem [shape: f32[192,64], index: 2, kind: input, shape index: {}]   ;;  %s2949_s3 = inlined_call_operand.vmem [shape: f32[384,128], index: 3, kind: input, shape index: {}]   ;;  %s2950_s4 = inlined_call_operand.vmem [shape: f32[128,8], index: 4, kind: input, shape index: {}]   ;;  %s2951_s5 = inlined_call_operand.hbm [shape: f32[1,256], index: 5, kind: output, shape index: {}]  }
   0x1   :  { %v2204_v0 = vld [vmem:[%s2946_s0 + $0x8] sm:$0xff]  ;;  %v2209_v1 = vld [vmem:[%s2946_s0] sm:$0xff]  ;;  %248 = vmatprep.mubr.f32.mxu0 %v2160_v3  ;;  %2087 = vset.pattern.permute.xlu0 %v2161_v4  ;;  %v2233_v7 = vld [vmem:[%s2950_s4 + $0x10] sm:$0xff] }
   0x2   :  { %v111_v2 = vld [vmem:[%s2947_s1] sm:$0xff]  ;;  %184 = vmatprep.subr.mxu0 %v2204_v0  ;;  %2088 = vset.pattern.permute.xlu1 %v2161_v4  ;;  %v112_v6 = vld [vmem:[%s2947_s1 + $0x8] sm:$0xff]  ;;  %v2245_v9 = vld [vmem:[%s2950_s4 + $0x18] sm:$0xff] }
   0x3   :  { %185 = vmatpush1.msra.mxu0 %v2209_v1  ;;  %v2222_v5 = vld [vmem:[%s2950_s4] sm:$0xff]  ;;  %v2238_v8 = vld [vmem:[%s2950_s4 + $0x8] sm:$0xff]  ;;  %131 = vperm.xlu1 %2088, %v2233_v7  }
   0x4   :  { %1900 = vmatmul.mubr.msk.f32.vlgmr.msra.gmra.mrb[0].mxu0 %vm159_vm0, %v111_v2  ;;  %121 = vperm.xlu0 %2087, %v2222_v5  }
   0x5   :  { %254 = vmatprep.mubr.f32.mxu0 %v2160_v3  ;;  %434 = vmatprep.mubr.f32.mxu1 %v2160_v3 }
   0x6   :  { %10 = vsyncpa [#allocation3], 0  ;;  %v113_v10 = vld [vmem:[%s2947_s1 + $0x10] sm:$0xff]  ;;  %v2257_v11 = vld [vmem:[%s2950_s4 + $0x20] sm:$0xff]  ;;  %v2162_v20 = vmov 1   ;;  %vm345_vm1 = vcmask 523264  }
   0x7   :  { %136 = vperm.xlu1 %2088, %v2245_v9   ;;  %v2262_v12 = vld [vmem:[%s2950_s4 + $0x28] sm:$0xff]  ;;  %v114_v13 = vld [vmem:[%s2947_s1 + $0x18] sm:$0xff]  ;;  %v2274_v14 = vld [vmem:[%s2950_s4 + $0x30] sm:$0xff] }
   0x8   :  { %1901 = vmatmul.mubr.msk.f32.gmra.mrb[2].mxu0 %vm159_vm0, %v112_v6  ;;  %126 = vperm.xlu0 %2087, %v2238_v8   ;;  %v2279_v15 = vld [vmem:[%s2950_s4 + $0x38] sm:$0xff]  ;;  %v115_v16 = vld [vmem:[%s2947_s1 + $0x20] sm:$0xff]  ;;  %v116_v17 = vld [vmem:[%s2947_s1 + $0x28] sm:$0xff] }
   0x9   :  { %260 = vmatprep.mubr.f32.mxu0 %v2160_v3  ;;  %v117_v18 = vld [vmem:[%s2947_s1 + $0x30] sm:$0xff]  ;;  %v118_v19 = vld [vmem:[%s2947_s1 + $0x38] sm:$0xff] }
   0xb   :  { %146 = vperm.xlu1 %2088, %v2262_v12  }
   0xc   :  { %1902 = vmatmul.mubr.msk.f32.gmra.mrb[4].mxu0 %vm159_vm0, %v113_v10  ;;  %141 = vperm.xlu0 %2087, %v2257_v11  }
   0xd   :  { %266 = vmatprep.mubr.f32.mxu0 %v2160_v3 }
   0xf   :  { %156 = vperm.xlu1 %2088, %v2279_v15  }
  0x10   :  { %1903 = vmatmul.mubr.msk.f32.gmra.mrb[6].mxu0 %vm159_vm0, %v114_v13  ;;  %151 = vperm.xlu0 %2087, %v2274_v14  }
  0x11   :  { %272 = vmatprep.mubr.f32.mxu0 %v2160_v3 }
  0x13   :  { %2090 = vset.pattern.permute.xlu1 %v2162_v20 }
  0x14   :  { %1904 = vmatmul.mubr.msk.f32.gmra.mrb[8].mxu0 %vm159_vm0, %v115_v16  ;;  %2089 = vset.pattern.permute.xlu0 %v2162_v20 }
  0x15   :  { %278 = vmatprep.mubr.f32.mxu0 %v2160_v3  ;;  %318 = vperm.xlu1 %2090, %v2238_v8  }
  0x16   :  { %314 = vperm.xlu0 %2089, %v2222_v5  }
  0x18   :  { %1905 = vmatmul.mubr.msk.f32.gmra.mrb[10].mxu0 %vm159_vm0, %v116_v17 }
  0x19   :  { %284 = vmatprep.mubr.f32.mxu0 %v2160_v3  ;;  %322 = vperm.xlu1 %2090, %v2233_v7  }
  0x1a   :  { %326 = vperm.xlu0 %2089, %v2245_v9  }
  0x1c   :  { %1906 = vmatmul.mubr.msk.f32.gmra.mrb[12].mxu0 %vm159_vm0, %v117_v18 }
  0x1d   :  { %290 = vmatprep.mubr.f32.mxu0 %v2160_v3  ;;  %330 = vperm.xlu1 %2090, %v2257_v11  }
  0x1e   :  { %334 = vperm.xlu0 %2089, %v2262_v12  }
  0x20   :  { %1907 = vmatmul.mubr.msk.f32.gmra.mrb[14].mxu0 %vm159_vm0, %v118_v19 }
  0x21   :  { %723 = vmatprep.mubr.f32.mxu0 %v2160_v3  ;;  %338 = vperm.xlu1 %2090, %v2274_v14  }
  0x22   :  { %342 = vperm.xlu0 %2089, %v2279_v15  }
  0x82   :  { %v132_v30 = vpop.permute.xlu1 %131 }
  0x83   :  { %v122_v21 = vpop.permute.xlu0 %121 }
  0x86   :  { %v137_v41 = vpop.permute.xlu1 %136 }
  0x87   :  { %v127_v24 = vpop.permute.xlu0 %126 }
  0x8a   :  { %v147_v57 = vpop.permute.xlu1 %146 }
  0x8b   :  { %v142_v54 = vpop.permute.xlu0 %141 }
  0x8f   :  { %v152_v18 = vpop.permute.xlu0 %151 }
  0xd7   :  { %v250_v22 = vpop.f32.mrb[0].mxu0 }
  0xd8   :  { %v252_v23 = vpop.f32.mrb[1].mxu0  ;;  %v251_v25 = vadd.f32 %v250_v22, %v122_v21 }
  0xd9   :  { %v253_v26 = vadd.f32 %v252_v23, %v122_v21  ;;  %v157_v21 = vpop.permute.xlu1 %156 }
  0xda   :  { %v297_v32 = vmax.f32 %v251_v25, 0.0 }
  0xdb   :  { %v256_v27 = vpop.f32.mrb[2].mxu0  ;;  %v298_v34 = vmax.f32 %v253_v26, 0.0 }
  0xdc   :  { %v257_v28 = vadd.f32 %v256_v27, %v127_v24  ;;  %v258_v29 = vpop.f32.mrb[3].mxu0 }
  0xdd   :  { %v259_v31 = vadd.f32 %v258_v29, %v127_v24 }
  0xde   :  { %v299_v33 = vmax.f32 %v257_v28, 0.0 }
  0xdf   :  { %v300_v35 = vmax.f32 %v259_v31, 0.0  ;;  %v262_v36 = vpop.f32.mrb[4].mxu0 }
  0xe0   :  { %v264_v37 = vpop.f32.mrb[5].mxu0  ;;  %v1934_v38 = vpack.c.bf16 %v299_v33, %v297_v32  ;;  %v263_v40 = vadd.f32 %v262_v36, %v132_v30  ;;  %v39_v33 = vld [vmem:[%s2948_s2] sm:$0xff]  ;;  %v42_v36 = vld [vmem:[%s2948_s2 + $0x18] sm:$0xff] }
  0xe1   :  { %v1932_v39 = vpack.c.bf16 %v300_v35, %v298_v34  ;;  %v265_v42 = vadd.f32 %v264_v37, %v132_v30  ;;  %v40_v34 = vld [vmem:[%s2948_s2 + $0x8] sm:$0xff]  ;;  %v41_v35 = vld [vmem:[%s2948_s2 + $0x10] sm:$0xff]  ;;  %v43_v37 = vld [vmem:[%s2948_s2 + $0x20] sm:$0xff] }
  0xe2   :  { %v301_v47 = vmax.f32 %v263_v40, 0.0  ;;  %v46_v40 = vld [vmem:[%s2948_s2 + $0x38] sm:$0xff] }
  0xe3   :  { %v268_v43 = vpop.f32.mrb[6].mxu0  ;;  %1933 = vmatprep.subr.bf16.mxu1 %v1932_v39  ;;  %v302_v49 = vmax.f32 %v265_v42, 0.0  ;;  %v45_v39 = vld [vmem:[%s2948_s2 + $0x30] sm:$0xff]  ;;  %v2164_v42 = vmov 3  }
  0xe4   :  { %v269_v44 = vadd.f32 %v268_v43, %v137_v41  ;;  %v270_v45 = vpop.f32.mrb[7].mxu0  ;;  %1935 = vmatpush1.bf16.msra.mxu1 %v1934_v38  ;;  %v44_v38 = vld [vmem:[%s2948_s2 + $0x28] sm:$0xff]  ;;  %2092 = vset.pattern.permute.xlu0 %v2164_v42  ;;  %v2366_v43 = vld [vmem:[%s2950_s4 + $0x40] sm:$0xff] }
  0xe5   :  { %v271_v46 = vadd.f32 %v270_v45, %v137_v41  ;;  %v2163_v41 = vmov 2   ;;  %821 = vperm.xlu0 %2092, %v2222_v5   ;;  %v315_v45 = vpop.permute.xlu0 %314 }
  0xe6   :  { %v303_v48 = vmax.f32 %v269_v44, 0.0  ;;  %2091 = vset.pattern.permute.xlu1 %v2163_v41  ;;  %v2382_v44 = vld [vmem:[%s2950_s4 + $0x48] sm:$0xff] }
  0xe7   :  { %v304_v50 = vmax.f32 %v271_v46, 0.0  ;;  %v274_v51 = vpop.f32.mrb[8].mxu0  ;;  %500 = vperm.xlu1 %2091, %v2222_v5  }
  0xe8   :  { %v1938_v52 = vpack.c.bf16 %v303_v48, %v301_v47  ;;  %v276_v53 = vpop.f32.mrb[9].mxu0  ;;  %v275_v56 = vadd.f32 %v274_v51, %v142_v54  ;;  %v2390_v47 = vld [vmem:[%s2950_s4 + $0x50] sm:$0xff] }
  0xe9   :  { %v1936_v55 = vpack.c.bf16 %v304_v50, %v302_v49  ;;  %v277_v58 = vadd.f32 %v276_v53, %v142_v54  ;;  %837 = vperm.xlu0 %2092, %v2257_v11   ;;  %v319_v49 = vpop.permute.xlu1 %318  ;;  %v2398_v53 = vld [vmem:[%s2950_s4 + $0x68] sm:$0xff] }
  0xea   :  { %v305_v63 = vmax.f32 %v275_v56, 0.0 }
  0xeb   :  { %v280_v59 = vpop.f32.mrb[10].mxu0  ;;  %1937 = vmatprep.subr.bf16.mxu1 %v1936_v55  ;;  %v306_v6 = vmax.f32 %v277_v58, 0.0  ;;  %508 = vperm.xlu1 %2091, %v2233_v7  }
  0xec   :  { %v281_v60 = vadd.f32 %v280_v59, %v147_v57  ;;  %v282_v61 = vpop.f32.mrb[11].mxu0  ;;  %1939 = vmatpush1.bf16.msra.mxu1 %v1938_v52 }
  0xed   :  { %v283_v62 = vadd.f32 %v282_v61, %v147_v57  ;;  %853 = vperm.xlu0 %2092, %v2366_v43   ;;  %v323_v59 = vpop.permute.xlu1 %322 }
  0xee   :  { %v307_v2 = vmax.f32 %v281_v60, 0.0 }
  0xef   :  { %v308_v10 = vmax.f32 %v283_v62, 0.0  ;;  %v286_v13 = vpop.f32.mrb[12].mxu0  ;;  %512 = vperm.xlu1 %2091, %v2245_v9  }
  0xf0   :  { %v1942_v16 = vpack.c.bf16 %v307_v2, %v305_v63  ;;  %v288_v17 = vpop.f32.mrb[13].mxu0  ;;  %v287_v20 = vadd.f32 %v286_v13, %v152_v18  ;;  %v2405_v63 = vld [vmem:[%s2950_s4 + $0x70] sm:$0xff] }
  0xf1   :  { %v1940_v19 = vpack.c.bf16 %v308_v10, %v306_v6  ;;  %v289_v22 = vadd.f32 %v288_v17, %v152_v18  ;;  %2101 = vset.pattern.permute.xlu0 %v2163_v41 }
  0xf2   :  { %v309_v27 = vmax.f32 %v287_v20, 0.0  ;;  %504 = vperm.xlu0 %2101, %v2238_v8  }
  0xf3   :  { %v292_v23 = vpop.f32.mrb[14].mxu0  ;;  %1941 = vmatprep.subr.bf16.mxu1 %v1940_v19  ;;  %v310_v29 = vmax.f32 %v289_v22, 0.0  ;;  %2093 = vset.pattern.permute.xlu1 %v2164_v42 }
  0xf4   :  { %v293_v24 = vadd.f32 %v292_v23, %v157_v21  ;;  %v294_v25 = vpop.f32.mrb[15].mxu0  ;;  %1943 = vmatpush1.bf16.msra.mxu1 %v1942_v16  ;;  %825 = vperm.xlu1 %2093, %v2238_v8   ;;  %v327_v16 = vpop.permute.xlu0 %326 }
  0xf5   :  { %v295_v26 = vadd.f32 %v294_v25, %v157_v21  ;;  %v2418_v25 = vld [vmem:[%s2950_s4 + $0x60] sm:$0xff] }
  0xf6   :  { %v311_v28 = vmax.f32 %v293_v24, 0.0  ;;  %520 = vperm.xlu0 %2101, %v2262_v12   ;;  %v2413_v24 = vld [vmem:[%s2950_s4 + $0x58] sm:$0xff] }
  0xf7   :  { %v312_v30 = vmax.f32 %v295_v26, 0.0 }
  0xf8   :  { %v1946_v31 = vpack.c.bf16 %v311_v28, %v309_v27  ;;  %2094 = vset.pattern.permute.xlu1 %v2163_v41 }
  0xf9   :  { %v1944_v32 = vpack.c.bf16 %v312_v30, %v310_v29  ;;  %516 = vperm.xlu1 %2094, %v2257_v11  }
  0xfa   :  { %524 = vperm.xlu0 %2101, %v2274_v14  }
  0xfb   :  { %1945 = vmatprep.subr.bf16.mxu1 %v1944_v32 }
  0xfc   :  { %1947 = vmatpush1.bf16.msra.mxu1 %v1946_v31  ;;  %v331_v31 = vpop.permute.xlu1 %330 }
  0xfd   :  { %2095 = vset.pattern.permute.xlu1 %v2164_v42 }
  0xfe   :  { %829 = vperm.xlu1 %2095, %v2233_v7   ;;  %538 = vperm.xlu0 %2101, %v2382_v44  }
  0xff   :  { %1908 = vmatmul.mubr.msk.f32.vlgmr.msra.gmra.mrb[0].mxu1 %vm345_vm1, %v39_v33 }
 0x100   :  { %440 = vmatprep.mubr.f32.mxu1 %v2160_v3 }
 0x102   :  { %833 = vperm.xlu1 %2095, %v2245_v9   ;;  %543 = vperm.xlu0 %2101, %v2390_v47  }
 0x103   :  { %1909 = vmatmul.mubr.msk.f32.gmra.mrb[2].mxu1 %vm345_vm1, %v40_v34  ;;  %v2427_v34 = vld [vmem:[%s2950_s4 + $0x78] sm:$0xff] }
 0x104   :  { %446 = vmatprep.mubr.f32.mxu1 %v2160_v3 }
 0x106   :  { %2096 = vset.pattern.permute.xlu1 %v2163_v41  ;;  %558 = vperm.xlu0 %2101, %v2398_v53  }
 0x107   :  { %1910 = vmatmul.mubr.msk.f32.gmra.mrb[4].mxu1 %vm345_vm1, %v41_v35  ;;  %528 = vperm.xlu1 %2096, %v2279_v15   ;;  %v335_v35 = vpop.permute.xlu0 %334 }
 0x108   :  { %452 = vmatprep.mubr.f32.mxu1 %v2160_v3 }
 0x10a   :  { %563 = vperm.xlu0 %2101, %v2405_v63  }
 0x10b   :  { %1911 = vmatmul.mubr.msk.f32.gmra.mrb[6].mxu1 %vm345_vm1, %v42_v36  ;;  %2097 = vset.pattern.permute.xlu1 %v2164_v42 }
 0x10c   :  { %458 = vmatprep.mubr.f32.mxu1 %v2160_v3  ;;  %841 = vperm.xlu1 %2097, %v2262_v12  }
 0x10e   :  { %2106 = vset.pattern.permute.xlu0 %v2164_v42 }
 0x10f   :  { %1912 = vmatmul.mubr.msk.f32.gmra.mrb[8].mxu1 %vm345_vm1, %v43_v37  ;;  %869 = vperm.xlu0 %2106, %v2418_v25  }
 0x110   :  { %464 = vmatprep.mubr.f32.mxu1 %v2160_v3  ;;  %2098 = vset.pattern.permute.xlu1 %v2163_v41 }
 0x111   :  { %533 = vperm.xlu1 %2098, %v2366_v43  }
 0x113   :  { %1913 = vmatmul.mubr.msk.f32.gmra.mrb[10].mxu1 %vm345_vm1, %v44_v38  ;;  %881 = vperm.xlu0 %2106, %v2427_v34  }
 0x114   :  { %470 = vmatprep.mubr.f32.mxu1 %v2160_v3 }
 0x115   :  { %2099 = vset.pattern.permute.xlu1 %v2164_v42 }
 0x116   :  { %845 = vperm.xlu1 %2099, %v2274_v14  }
 0x117   :  { %1914 = vmatmul.mubr.msk.f32.gmra.mrb[12].mxu1 %vm345_vm1, %v45_v39 }
 0x118   :  { %476 = vmatprep.mubr.f32.mxu1 %v2160_v3 }
 0x11a   :  { %849 = vperm.xlu1 %2099, %v2279_v15  }
 0x11b   :  { %1915 = vmatmul.mubr.msk.f32.gmra.mrb[14].mxu1 %vm345_vm1, %v46_v40 }
 0x11c   :  { %1076 = vmatprep.mubr.f32.mxu1 %v2160_v3 }
 0x11e   :  { %2100 = vset.pattern.permute.xlu1 %v2163_v41 }
 0x11f   :  { %548 = vperm.xlu1 %2100, %v2413_v24  }
 0x123   :  { %2102 = vset.pattern.permute.xlu1 %v2164_v42 }
 0x124   :  { %857 = vperm.xlu1 %2102, %v2382_v44  }
 0x128   :  { %2103 = vset.pattern.permute.xlu1 %v2163_v41 }
 0x129   :  { %553 = vperm.xlu1 %2103, %v2418_v25  }
 0x12d   :  { %2104 = vset.pattern.permute.xlu1 %v2164_v42 }
 0x12e   :  { %861 = vperm.xlu1 %2104, %v2390_v47  }
 0x132   :  { %865 = vperm.xlu1 %2104, %v2413_v24  }
 0x136   :  { %2105 = vset.pattern.permute.xlu1 %v2163_v41  ;;  %v50_v41 = vld [vmem:[%s2948_s2 + $0x58] sm:$0xff] }
 0x137   :  { %568 = vperm.xlu1 %2105, %v2427_v34  }
 0x13b   :  { %2107 = vset.pattern.permute.xlu1 %v2164_v42  ;;  %v51_v42 = vld [vmem:[%s2948_s2 + $0x60] sm:$0xff] }
 0x13c   :  { %873 = vperm.xlu1 %2107, %v2398_v53  }
 0x140   :  { %877 = vperm.xlu1 %2107, %v2405_v63  }
 0x1d2   :  { %v436_v46 = vpop.f32.mrb[0].mxu1 }
 0x1d3   :  { %v438_v48 = vpop.f32.mrb[1].mxu1  ;;  %v437_v50 = vadd.f32 %v436_v46, %v315_v45 }
 0x1d4   :  { %v439_v51 = vadd.f32 %v438_v48, %v315_v45 }
 0x1d5   :  { %v483_v57 = vmax.f32 %v437_v50, 0.0 }
 0x1d6   :  { %v442_v52 = vpop.f32.mrb[2].mxu1  ;;  %v484_v60 = vmax.f32 %v439_v51, 0.0 }
 0x1d7   :  { %v443_v54 = vadd.f32 %v442_v52, %v319_v49  ;;  %v444_v55 = vpop.f32.mrb[3].mxu1 }
 0x1d8   :  { %v445_v56 = vadd.f32 %v444_v55, %v319_v49 }
 0x1d9   :  { %v485_v58 = vmax.f32 %v443_v54, 0.0  ;;  %v339_v54 = vpop.permute.xlu1 %338 }
 0x1da   :  { %v486_v61 = vmax.f32 %v445_v56, 0.0  ;;  %v448_v62 = vpop.f32.mrb[4].mxu1 }
 0x1db   :  { %v1950_v2 = vpack.c.bf16 %v485_v58, %v483_v57  ;;  %v450_v6 = vpop.f32.mrb[5].mxu1  ;;  %v449_v13 = vadd.f32 %v448_v62, %v323_v59  ;;  %v343_v57 = vpop.permute.xlu0 %342 }
 0x1dc   :  { %v1948_v10 = vpack.c.bf16 %v486_v61, %v484_v60  ;;  %v451_v17 = vadd.f32 %v450_v6, %v323_v59 }
 0x1dd   :  { %v487_v22 = vmax.f32 %v449_v13, 0.0 }
 0x1de   :  { %v454_v18 = vpop.f32.mrb[6].mxu1  ;;  %1949 = vmatprep.subr.bf16.mxu0 %v1948_v10  ;;  %v488_v26 = vmax.f32 %v451_v17, 0.0 }
 0x1df   :  { %v455_v19 = vadd.f32 %v454_v18, %v327_v16  ;;  %v456_v20 = vpop.f32.mrb[7].mxu1  ;;  %1951 = vmatpush1.bf16.msra.mxu0 %v1950_v2  ;;  %v47_v18 = vld [vmem:[%s2948_s2 + $0x40] sm:$0xff] }
 0x1e0   :  { %v457_v21 = vadd.f32 %v456_v20, %v327_v16  ;;  %v49_v20 = vld [vmem:[%s2948_s2 + $0x50] sm:$0xff] }
 0x1e1   :  { %v489_v23 = vmax.f32 %v455_v19, 0.0  ;;  %v48_v19 = vld [vmem:[%s2948_s2 + $0x48] sm:$0xff] }
 0x1e2   :  { %v490_v27 = vmax.f32 %v457_v21, 0.0  ;;  %v460_v28 = vpop.f32.mrb[8].mxu1  ;;  %v52_v21 = vld [vmem:[%s2948_s2 + $0x68] sm:$0xff] }
 0x1e3   :  { %v1954_v29 = vpack.c.bf16 %v489_v23, %v487_v22  ;;  %v462_v30 = vpop.f32.mrb[9].mxu1  ;;  %v461_v33 = vadd.f32 %v460_v28, %v331_v31  ;;  %v53_v22 = vld [vmem:[%s2948_s2 + $0x70] sm:$0xff]  ;;  %v54_v23 = vld [vmem:[%s2948_s2 + $0x78] sm:$0xff] }
 0x1e4   :  { %v1952_v32 = vpack.c.bf16 %v490_v27, %v488_v26  ;;  %v463_v36 = vadd.f32 %v462_v30, %v331_v31  ;;  %v55_v26 = vld [vmem:[%s2948_s2 + $0x80] sm:$0xff]  ;;  %v56_v27 = vld [vmem:[%s2948_s2 + $0x88] sm:$0xff]  ;;  %v57_v28 = vld [vmem:[%s2948_s2 + $0x90] sm:$0xff] }
 0x1e5   :  { %v491_v45 = vmax.f32 %v461_v33, 0.0  ;;  %v59_v30 = vld [vmem:[%s2948_s2 + $0xa0] sm:$0xff]  ;;  %v60_v31 = vld [vmem:[%s2948_s2 + $0xa8] sm:$0xff]  ;;  %v62_v33 = vld [vmem:[%s2948_s2 + $0xb8] sm:$0xff] }
 0x1e6   :  { %v466_v37 = vpop.f32.mrb[10].mxu1  ;;  %1953 = vmatprep.subr.bf16.mxu0 %v1952_v32  ;;  %v492_v48 = vmax.f32 %v463_v36, 0.0  ;;  %v61_v32 = vld [vmem:[%s2948_s2 + $0xb0] sm:$0xff] }
 0x1e7   :  { %v467_v38 = vadd.f32 %v466_v37, %v335_v35  ;;  %v468_v39 = vpop.f32.mrb[11].mxu1  ;;  %1955 = vmatpush1.bf16.msra.mxu0 %v1954_v29  ;;  %v58_v29 = vld [vmem:[%s2948_s2 + $0x98] sm:$0xff] }
 0x1e8   :  { %v469_v40 = vadd.f32 %v468_v39, %v335_v35  ;;  %v501_v35 = vpop.permute.xlu1 %500 }
 0x1e9   :  { %v493_v46 = vmax.f32 %v467_v38, 0.0 }
 0x1ea   :  { %v494_v49 = vmax.f32 %v469_v40, 0.0  ;;  %v472_v50 = vpop.f32.mrb[12].mxu1 }
 0x1eb   :  { %v1958_v51 = vpack.c.bf16 %v493_v46, %v491_v45  ;;  %v474_v52 = vpop.f32.mrb[13].mxu1  ;;  %v473_v56 = vadd.f32 %v472_v50, %v339_v54  ;;  %v822_v45 = vpop.permute.xlu0 %821  ;;  %v571_v46 = vlaneseq }
 0x1ec   :  { %v1956_v55 = vpack.c.bf16 %v494_v49, %v492_v48  ;;  %v475_v58 = vadd.f32 %v474_v52, %v339_v54  ;;  %v509_v36 = vpop.permute.xlu1 %508 }
 0x1ed   :  { %v495_v2 = vmax.f32 %v473_v56, 0.0  ;;  %v2529_v50 = vshrl.u32 %v571_v46, 7  ;;  %vm1883_vm2 = vcmp.lt.s32.totalorder %v571_v46, 256 }
 0x1ee   :  { %v478_v59 = vpop.f32.mrb[14].mxu1  ;;  %1957 = vmatprep.subr.bf16.mxu0 %v1956_v55  ;;  %v496_v10 = vmax.f32 %v475_v58, 0.0 }
 0x1ef   :  { %v479_v60 = vadd.f32 %v478_v59, %v343_v57  ;;  %v480_v61 = vpop.f32.mrb[15].mxu1  ;;  %1959 = vmatpush1.bf16.msra.mxu0 %v1958_v51  ;;  %v2526_v49 = vpop.permute.xlu0 %837  ;;  %v573_v52 = vsub.s32 0, %v2529_v50 }
 0x1f0   :  { %v481_v62 = vadd.f32 %v480_v61, %v343_v57  ;;  %v513_v37 = vpop.permute.xlu1 %512 }
 0x1f1   :  { %v497_v6 = vmax.f32 %v479_v60, 0.0  ;;  %v2539_v56 = vrot.slane %v2209_v1, %v573_v52  ;;  %v2542_v57 = vrot.slane %v2204_v0, %v573_v52 }
 0x1f2   :  { %v498_v13 = vmax.f32 %v481_v62, 0.0 }
 0x1f3   :  { %v1962_v16 = vpack.c.bf16 %v497_v6, %v495_v2  ;;  %v2534_v54 = vpop.permute.xlu0 %853  ;;  %v579_v59 = vmul.f32 %v2539_v56, %v501_v35  ;;  %v580_v61 = vmul.f32 %v2542_v57, %v501_v35  ;;  %v2165_v2 = vmov 4  }
 0x1f4   :  { %v1960_v17 = vpack.c.bf16 %v498_v13, %v496_v10  ;;  %v826_v38 = vpop.permute.xlu1 %825  ;;  %2108 = vset.pattern.permute.xlu1 %v2165_v2  ;;  %2109 = vset.pattern.permute.xlu0 %v2165_v2  ;;  %v586_v35 = vmul.f32 %v2542_v57, %v513_v37 }
 0x1f5   :  { %949 = vperm.xlu1 %2108, %v2222_v5   ;;  %953 = vperm.xlu0 %2109, %v2238_v8   ;;  %v583_v5 = vmul.f32 %v2539_v56, %v509_v36 }
 0x1f6   :  { %1961 = vmatprep.subr.bf16.mxu0 %v1960_v17 }
 0x1f7   :  { %1963 = vmatpush1.bf16.msra.mxu0 %v1962_v16  ;;  %v505_v58 = vpop.permute.xlu0 %504 }
 0x1f8   :  { %v2522_v39 = vpop.permute.xlu1 %516  ;;  %v581_v13 = vmul.f32 %v2539_v56, %v505_v58  ;;  %v582_v1 = vmul.f32 %v2542_v57, %v505_v58 }
 0x1f9   :  { %957 = vperm.xlu1 %2108, %v2233_v7   ;;  %965 = vperm.xlu0 %2109, %v2257_v11  }
 0x1fa   :  { %1916 = vmatmul.mubr.msk.f32.vlgmr.msra.gmra.mrb[16].mxu0 %vm345_vm1, %v47_v18 }
 0x1fb   :  { %729 = vmatprep.mubr.f32.mxu0 %v2160_v3 }
 0x1fc   :  { %v830_v40 = vpop.permute.xlu1 %829 }
 0x1fd   :  { %961 = vperm.xlu1 %2108, %v2245_v9   ;;  %973 = vperm.xlu0 %2109, %v2274_v14   ;;  %v521_v14 = vpop.permute.xlu0 %520 }
 0x1fe   :  { %1917 = vmatmul.mubr.msk.f32.gmra.mrb[18].mxu0 %vm345_vm1, %v48_v19 }
 0x1ff   :  { %735 = vmatprep.mubr.f32.mxu0 %v2160_v3 }
 0x200   :  { %v2524_v48 = vpop.permute.xlu1 %833 }
 0x201   :  { %969 = vperm.xlu1 %2108, %v2262_v12   ;;  %981 = vperm.xlu0 %2109, %v2366_v43   ;;  %v589_v43 = vmul.f32 %v2539_v56, %v521_v14 }
 0x202   :  { %1918 = vmatmul.mubr.msk.f32.gmra.mrb[20].mxu0 %vm345_vm1, %v49_v20 }
 0x203   :  { %741 = vmatprep.mubr.f32.mxu0 %v2160_v3 }
 0x204   :  { %v2531_v51 = vpop.permute.xlu1 %528 }
 0x205   :  { %977 = vperm.xlu1 %2108, %v2279_v15   ;;  %989 = vperm.xlu0 %2109, %v2390_v47  }
 0x206   :  { %1919 = vmatmul.mubr.msk.f32.gmra.mrb[22].mxu0 %vm345_vm1, %v50_v41 }
 0x207   :  { %747 = vmatprep.mubr.f32.mxu0 %v2160_v3 }
 0x208   :  { %v2536_v55 = vpop.permute.xlu1 %841 }
 0x209   :  { %985 = vperm.xlu1 %2108, %v2382_v44   ;;  %997 = vperm.xlu0 %2109, %v2418_v25  }
 0x20a   :  { %1920 = vmatmul.mubr.msk.f32.gmra.mrb[24].mxu0 %vm345_vm1, %v51_v42 }
 0x20b   :  { %753 = vmatprep.mubr.f32.mxu0 %v2160_v3 }
 0x20c   :  { %v2546_v62 = vpop.permute.xlu1 %533 }
 0x20d   :  { %993 = vperm.xlu1 %2108, %v2413_v24   ;;  %1005 = vperm.xlu0 %2109, %v2405_v63  }
 0x20e   :  { %1921 = vmatmul.mubr.msk.f32.gmra.mrb[26].mxu0 %vm345_vm1, %v52_v21 }
 0x20f   :  { %759 = vmatprep.mubr.f32.mxu0 %v2160_v3 }
 0x210   :  { %v2554_v42 = vpop.permute.xlu1 %845 }
 0x211   :  { %1001 = vperm.xlu1 %2108, %v2398_v53  }
 0x212   :  { %1922 = vmatmul.mubr.msk.f32.gmra.mrb[28].mxu0 %vm345_vm1, %v53_v22 }
 0x213   :  { %765 = vmatprep.mubr.f32.mxu0 %v2160_v3 }
 0x215   :  { %1009 = vperm.xlu1 %2108, %v2427_v34  }
 0x216   :  { %1923 = vmatmul.mubr.msk.f32.gmra.mrb[30].mxu0 %vm345_vm1, %v54_v23  ;;  %v584_v23 = vmul.f32 %v2542_v57, %v509_v36 }
 0x217   :  { %771 = vmatprep.mubr.f32.mxu0 %v2160_v3 }
 0x21a   :  { %1924 = vmatmul.mubr.msk.f32.gmra.mrb[32].mxu0 %vm345_vm1, %v55_v26 }
 0x21b   :  { %777 = vmatprep.mubr.f32.mxu0 %v2160_v3 }
 0x21e   :  { %1925 = vmatmul.mubr.msk.f32.gmra.mrb[34].mxu0 %vm345_vm1, %v56_v27 }
 0x21f   :  { %783 = vmatprep.mubr.f32.mxu0 %v2160_v3 }
 0x222   :  { %1926 = vmatmul.mubr.msk.f32.gmra.mrb[36].mxu0 %vm345_vm1, %v57_v28 }
 0x223   :  { %789 = vmatprep.mubr.f32.mxu0 %v2160_v3 }
 0x226   :  { %1927 = vmatmul.mubr.msk.f32.gmra.mrb[38].mxu0 %vm345_vm1, %v58_v29 }
 0x227   :  { %795 = vmatprep.mubr.f32.mxu0 %v2160_v3 }
 0x22a   :  { %1928 = vmatmul.mubr.msk.f32.gmra.mrb[40].mxu0 %vm345_vm1, %v59_v30 }
 0x22b   :  { %801 = vmatprep.mubr.f32.mxu0 %v2160_v3 }
 0x22e   :  { %1929 = vmatmul.mubr.msk.f32.gmra.mrb[42].mxu0 %vm345_vm1, %v60_v31 }
 0x22f   :  { %807 = vmatprep.mubr.f32.mxu0 %v2160_v3 }
 0x232   :  { %1930 = vmatmul.mubr.msk.f32.gmra.mrb[44].mxu0 %vm345_vm1, %v61_v32  ;;  %v585_v32 = vmul.f32 %v2539_v56, %v513_v37  ;;  %v587_v37 = vmul.f32 %v2539_v56, %v2522_v39 }
 0x233   :  { %813 = vmatprep.mubr.f32.mxu0 %v2160_v3 }
 0x236   :  { %1931 = vmatmul.mubr.msk.f32.gmra.mrb[46].mxu0 %vm345_vm1, %v62_v33 }
 0x237   :  { %1333 = vmatprep.mubr.f32.mxu0 %v2160_v3 }
 0x2cd   :  { %v725_v60 = vpop.f32.mrb[16].mxu0 }
 0x2ce   :  { %v726_v6 = vadd.f32 %v725_v60, %v579_v59  ;;  %v727_v10 = vpop.f32.mrb[17].mxu0 }
 0x2cf   :  { %v728_v0 = vadd.f32 %v727_v10, %v580_v61 }
 0x2d0   :  { %v884_v17 = vadd.f32 %v822_v45, %v726_v6  ;;  %v588_v6 = vmul.f32 %v2542_v57, %v2522_v39 }
 0x2d1   :  { %v731_v16 = vpop.f32.mrb[18].mxu0  ;;  %v885_v20 = vadd.f32 %v822_v45, %v728_v0  ;;  %v2562_v45 = vpop.permute.xlu1 %849 }
 0x2d2   :  { %v732_v18 = vadd.f32 %v731_v16, %v581_v13  ;;  %v733_v19 = vpop.f32.mrb[19].mxu0  ;;  %v916_v26 = vmax.f32 %v884_v17, 0.0  ;;  %v590_v16 = vmul.f32 %v2542_v57, %v521_v14 }
 0x2d3   :  { %v734_v41 = vadd.f32 %v733_v19, %v582_v1  ;;  %v917_v7 = vmax.f32 %v885_v20, 0.0  ;;  %v525_v19 = vpop.permute.xlu0 %524 }
 0x2d4   :  { %v886_v21 = vadd.f32 %v826_v38, %v732_v18  ;;  %v592_v15 = vmul.f32 %v2542_v57, %v525_v19 }
 0x2d5   :  { %v887_v22 = vadd.f32 %v826_v38, %v734_v41  ;;  %v737_v8 = vpop.f32.mrb[20].mxu0  ;;  %v2572_v10 = vpop.permute.xlu1 %548  ;;  %v591_v41 = vmul.f32 %v2539_v56, %v525_v19 }
 0x2d6   :  { %v918_v27 = vmax.f32 %v886_v21, 0.0  ;;  %v738_v28 = vadd.f32 %v737_v8, %v583_v5  ;;  %v739_v29 = vpop.f32.mrb[21].mxu0 }
 0x2d7   :  { %v919_v11 = vmax.f32 %v887_v22, 0.0  ;;  %v740_v30 = vadd.f32 %v739_v29, %v584_v23 }
 0x2d8   :  { %v1966_v31 = vpack.c.bf16 %v918_v27, %v916_v26  ;;  %v888_v36 = vadd.f32 %v830_v40, %v738_v28 }
 0x2d9   :  { %v743_v33 = vpop.f32.mrb[22].mxu0  ;;  %v1964_v38 = vpack.c.bf16 %v919_v11, %v917_v7  ;;  %v889_v9 = vadd.f32 %v830_v40, %v740_v30  ;;  %v858_v26 = vpop.permute.xlu1 %857 }
 0x2da   :  { %v744_v52 = vadd.f32 %v743_v33, %v585_v32  ;;  %v745_v58 = vpop.f32.mrb[23].mxu0  ;;  %v920_v12 = vmax.f32 %v888_v36, 0.0 }
 0x2db   :  { %v746_v59 = vadd.f32 %v745_v58, %v586_v35  ;;  %1965 = vmatprep.subr.bf16.mxu1 %v1964_v38  ;;  %v921_v1 = vmax.f32 %v889_v9, 0.0  ;;  %v593_v35 = vmul.f32 %v2539_v56, %v2531_v51  ;;  %v539_v38 = vpop.permute.xlu0 %538 }
 0x2dc   :  { %v890_v60 = vadd.f32 %v2524_v48, %v744_v52  ;;  %1967 = vmatpush1.bf16.msra.mxu1 %v1966_v31  ;;  %v597_v19 = vmul.f32 %v2539_v56, %v539_v38 }
 0x2dd   :  { %v891_v61 = vadd.f32 %v2524_v48, %v746_v59  ;;  %v749_v2 = vpop.f32.mrb[24].mxu0  ;;  %v2592_v9 = vpop.permute.xlu1 %553 }
 0x2de   :  { %v922_v40 = vmax.f32 %v890_v60, 0.0  ;;  %v750_v13 = vadd.f32 %v749_v2, %v587_v37  ;;  %v751_v0 = vpop.f32.mrb[25].mxu0  ;;  %v595_v2 = vmul.f32 %v2539_v56, %v2546_v62 }
 0x2df   :  { %v923_v48 = vmax.f32 %v891_v61, 0.0  ;;  %v752_v17 = vadd.f32 %v751_v0, %v588_v6 }
 0x2e0   :  { %v1970_v18 = vpack.c.bf16 %v922_v40, %v920_v12  ;;  %v892_v21 = vadd.f32 %v2526_v49, %v750_v13  ;;  %v544_v40 = vpop.permute.xlu0 %543 }
 0x2e1   :  { %v755_v39 = vpop.f32.mrb[26].mxu0  ;;  %v1968_v20 = vpack.c.bf16 %v923_v48, %v921_v1  ;;  %v893_v8 = vadd.f32 %v2526_v49, %v752_v17 }
 0x2e2   :  { %v756_v5 = vadd.f32 %v755_v39, %v589_v43  ;;  %v757_v22 = vpop.f32.mrb[27].mxu0  ;;  %v924_v7 = vmax.f32 %v892_v21, 0.0 }
 0x2e3   :  { %v758_v23 = vadd.f32 %v757_v22, %v590_v16  ;;  %1969 = vmatprep.subr.bf16.mxu1 %v1968_v20  ;;  %v925_v32 = vmax.f32 %v893_v8, 0.0  ;;  %v598_v20 = vmul.f32 %v2542_v57, %v539_v38  ;;  %v599_v8 = vmul.f32 %v2539_v56, %v544_v40 }
 0x2e4   :  { %v894_v27 = vadd.f32 %v2536_v55, %v756_v5  ;;  %1971 = vmatpush1.bf16.msra.mxu1 %v1970_v18  ;;  %v862_v18 = vpop.permute.xlu1 %861 }
 0x2e5   :  { %v895_v28 = vadd.f32 %v2536_v55, %v758_v23  ;;  %v761_v29 = vpop.f32.mrb[28].mxu0  ;;  %v594_v55 = vmul.f32 %v2542_v57, %v2531_v51  ;;  %v596_v51 = vmul.f32 %v2542_v57, %v2546_v62  ;;  %v559_v23 = vpop.permute.xlu0 %558 }
 0x2e6   :  { %v926_v11 = vmax.f32 %v894_v27, 0.0  ;;  %v762_v30 = vadd.f32 %v761_v29, %v591_v41  ;;  %v763_v31 = vpop.f32.mrb[29].mxu0 }
 0x2e7   :  { %v927_v33 = vmax.f32 %v895_v28, 0.0  ;;  %v764_v49 = vadd.f32 %v763_v31, %v592_v15  ;;  %v600_v28 = vmul.f32 %v2542_v57, %v544_v40 }
 0x2e8   :  { %v1974_v36 = vpack.c.bf16 %v926_v11, %v924_v7  ;;  %v896_v14 = vadd.f32 %v2554_v42, %v762_v30  ;;  %v866_v11 = vpop.permute.xlu1 %865 }
 0x2e9   :  { %v767_v52 = vpop.f32.mrb[30].mxu0  ;;  %v1972_v58 = vpack.c.bf16 %v927_v33, %v925_v32  ;;  %v897_v37 = vadd.f32 %v2554_v42, %v764_v49 }
 0x2ea   :  { %v768_v59 = vadd.f32 %v767_v52, %v593_v35  ;;  %v769_v60 = vpop.f32.mrb[31].mxu0  ;;  %v928_v13 = vmax.f32 %v896_v14, 0.0 }
 0x2eb   :  { %v770_v61 = vadd.f32 %v769_v60, %v594_v55  ;;  %1973 = vmatprep.subr.bf16.mxu1 %v1972_v58  ;;  %v929_v42 = vmax.f32 %v897_v37, 0.0  ;;  %v602_v55 = vmul.f32 %v2542_v57, %v2572_v10  ;;  %v564_v60 = vpop.permute.xlu0 %563 }
 0x2ec   :  { %v898_v6 = vadd.f32 %v2562_v45, %v768_v59  ;;  %1975 = vmatpush1.bf16.msra.mxu1 %v1974_v36 }
 0x2ed   :  { %v899_v12 = vadd.f32 %v2562_v45, %v770_v61  ;;  %v773_v43 = vpop.f32.mrb[32].mxu0 }
 0x2ee   :  { %v930_v0 = vmax.f32 %v898_v6, 0.0  ;;  %v774_v1 = vadd.f32 %v773_v43, %v595_v2  ;;  %v775_v16 = vpop.f32.mrb[33].mxu0  ;;  %v569_v2 = vpop.permute.xlu1 %568  ;;  %v603_v6 = vmul.f32 %v2539_v56, %v2592_v9 }
 0x2ef   :  { %v931_v48 = vmax.f32 %v899_v12, 0.0  ;;  %v776_v17 = vadd.f32 %v775_v16, %v596_v51  ;;  %v604_v12 = vmul.f32 %v2542_v57, %v2592_v9 }
 0x2f0   :  { %v1978_v39 = vpack.c.bf16 %v930_v0, %v928_v13  ;;  %v900_v45 = vadd.f32 %v2534_v54, %v774_v1 }
 0x2f1   :  { %v779_v62 = vpop.f32.mrb[34].mxu0  ;;  %v1976_v41 = vpack.c.bf16 %v931_v48, %v929_v42  ;;  %v901_v22 = vadd.f32 %v2534_v54, %v776_v17  ;;  %v601_v54 = vmul.f32 %v2539_v56, %v2572_v10  ;;  %v870_v17 = vpop.permute.xlu0 %869 }
 0x2f2   :  { %v780_v21 = vadd.f32 %v779_v62, %v597_v19  ;;  %v781_v5 = vpop.f32.mrb[35].mxu0  ;;  %v932_v30 = vmax.f32 %v900_v45, 0.0  ;;  %v874_v62 = vpop.permute.xlu1 %873 }
 0x2f3   :  { %v782_v15 = vadd.f32 %v781_v5, %v598_v20  ;;  %1977 = vmatprep.subr.bf16.mxu1 %v1976_v41  ;;  %v933_v49 = vmax.f32 %v901_v22, 0.0 }
 0x2f4   :  { %v902_v27 = vadd.f32 %v858_v26, %v780_v21  ;;  %1979 = vmatpush1.bf16.msra.mxu1 %v1978_v39  ;;  %v606_v39 = vmul.f32 %v2542_v57, %v559_v23 }
 0x2f5   :  { %v903_v29 = vadd.f32 %v858_v26, %v782_v15  ;;  %v785_v7 = vpop.f32.mrb[36].mxu0  ;;  %v607_v15 = vmul.f32 %v2539_v56, %v564_v60 }
 0x2f6   :  { %v934_v31 = vmax.f32 %v902_v27, 0.0  ;;  %v786_v32 = vadd.f32 %v785_v7, %v599_v8  ;;  %v787_v33 = vpop.f32.mrb[37].mxu0  ;;  %v608_v27 = vmul.f32 %v2542_v57, %v564_v60 }
 0x2f7   :  { %v935_v35 = vmax.f32 %v903_v29, 0.0  ;;  %v788_v38 = vadd.f32 %v787_v33, %v600_v28 }
 0x2f8   :  { %v1982_v36 = vpack.c.bf16 %v934_v31, %v932_v30  ;;  %v904_v14 = vadd.f32 %v862_v18, %v786_v32 }
 0x2f9   :  { %v791_v52 = vpop.f32.mrb[38].mxu0  ;;  %v1980_v58 = vpack.c.bf16 %v935_v35, %v933_v49  ;;  %v905_v37 = vadd.f32 %v862_v18, %v788_v38  ;;  %v605_v18 = vmul.f32 %v2539_v56, %v559_v23  ;;  %v878_v49 = vpop.permute.xlu1 %877  ;;  %v609_v35 = vmul.f32 %v2539_v56, %v569_v2 }
 0x2fa   :  { %v792_v26 = vadd.f32 %v791_v52, %v601_v54  ;;  %v793_v59 = vpop.f32.mrb[39].mxu0  ;;  %v936_v40 = vmax.f32 %v904_v14, 0.0  ;;  %v610_v54 = vmul.f32 %v2542_v57, %v569_v2  ;;  %v63_v57 = vld [vmem:[%s2949_s3] sm:$0xff]  ;;  %v64_v2 = vld [vmem:[%s2949_s3 + $0x8] sm:$0xff] }
 0x2fb   :  { %v794_v61 = vadd.f32 %v793_v59, %v602_v55  ;;  %1981 = vmatprep.subr.bf16.mxu1 %v1980_v58  ;;  %v937_v16 = vmax.f32 %v905_v37, 0.0  ;;  %v882_v59 = vpop.permute.xlu0 %881 }
 0x2fc   :  { %v906_v51 = vadd.f32 %v866_v11, %v792_v26  ;;  %1983 = vmatpush1.bf16.msra.mxu1 %v1982_v36 }
 0x2fd   :  { %v907_v43 = vadd.f32 %v866_v11, %v794_v61  ;;  %v797_v10 = vpop.f32.mrb[40].mxu0 }
 0x2fe   :  { %v938_v13 = vmax.f32 %v906_v51, 0.0  ;;  %v798_v0 = vadd.f32 %v797_v10, %v603_v6  ;;  %v799_v1 = vpop.f32.mrb[41].mxu0 }
 0x2ff   :  { %v939_v42 = vmax.f32 %v907_v43, 0.0  ;;  %v800_v48 = vadd.f32 %v799_v1, %v604_v12  ;;  %v68_v1 = vld [vmem:[%s2949_s3 + $0x28] sm:$0xff] }
 0x300   :  { %v1986_v19 = vpack.c.bf16 %v938_v13, %v936_v40  ;;  %v908_v45 = vadd.f32 %v870_v17, %v798_v0  ;;  %v65_v40 = vld [vmem:[%s2949_s3 + $0x10] sm:$0xff]  ;;  %v66_v13 = vld [vmem:[%s2949_s3 + $0x18] sm:$0xff]  ;;  %v67_v0 = vld [vmem:[%s2949_s3 + $0x20] sm:$0xff] }
 0x301   :  { %v803_v20 = vpop.f32.mrb[42].mxu0  ;;  %v1984_v41 = vpack.c.bf16 %v939_v42, %v937_v16  ;;  %v909_v5 = vadd.f32 %v870_v17, %v800_v48  ;;  %v69_v16 = vld [vmem:[%s2949_s3 + $0x30] sm:$0xff]  ;;  %v70_v42 = vld [vmem:[%s2949_s3 + $0x38] sm:$0xff]  ;;  %v71_v48 = vld [vmem:[%s2949_s3 + $0x40] sm:$0xff] }
 0x302   :  { %v804_v9 = vadd.f32 %v803_v20, %v605_v18  ;;  %v805_v21 = vpop.f32.mrb[43].mxu0  ;;  %v940_v7 = vmax.f32 %v908_v45, 0.0  ;;  %v72_v17 = vld [vmem:[%s2949_s3 + $0x48] sm:$0xff]  ;;  %v73_v18 = vld [vmem:[%s2949_s3 + $0x50] sm:$0xff]  ;;  %v950_v45 = vpop.permute.xlu1 %949 }
 0x303   :  { %v806_v22 = vadd.f32 %v805_v21, %v606_v39  ;;  %1985 = vmatprep.subr.bf16.mxu1 %v1984_v41  ;;  %v941_v31 = vmax.f32 %v909_v5, 0.0  ;;  %v75_v39 = vld [vmem:[%s2949_s3 + $0x60] sm:$0xff]  ;;  %v76_v20 = vld [vmem:[%s2949_s3 + $0x68] sm:$0xff]  ;;  %v78_v41 = vld [vmem:[%s2949_s3 + $0x78] sm:$0xff]  ;;  %v954_v5 = vpop.permute.xlu0 %953 }
 0x304   :  { %v910_v8 = vadd.f32 %v874_v62, %v804_v9  ;;  %1987 = vmatpush1.bf16.msra.mxu1 %v1986_v19  ;;  %v74_v19 = vld [vmem:[%s2949_s3 + $0x58] sm:$0xff] }
 0x305   :  { %v911_v28 = vadd.f32 %v874_v62, %v806_v22  ;;  %v809_v29 = vpop.f32.mrb[44].mxu0  ;;  %v77_v62 = vld [vmem:[%s2949_s3 + $0x70] sm:$0xff]  ;;  %v2166_v22 = vmov 5  }
 0x306   :  { %v942_v11 = vmax.f32 %v910_v8, 0.0  ;;  %v810_v23 = vadd.f32 %v809_v29, %v607_v15  ;;  %v811_v30 = vpop.f32.mrb[45].mxu0  ;;  %2111 = vset.pattern.permute.xlu1 %v2166_v22  ;;  %2110 = vset.pattern.permute.xlu0 %v2166_v22  ;;  %v2691_v8 = vld [vmem:[%s2950_s4 + $0x8] sm:$0xff] }
 0x307   :  { %v943_v32 = vmax.f32 %v911_v28, 0.0  ;;  %v812_v33 = vadd.f32 %v811_v30, %v608_v27  ;;  %1210 = vperm.xlu1 %2111, %v2691_v8   ;;  %v2697_v27 = vld [vmem:[%s2950_s4] sm:$0xff] }
 0x308   :  { %v1990_v38 = vpack.c.bf16 %v942_v11, %v940_v7  ;;  %v912_v52 = vadd.f32 %v878_v49, %v810_v23  ;;  %1206 = vperm.xlu0 %2110, %v2697_v27   ;;  %v958_v23 = vpop.permute.xlu1 %957 }
 0x309   :  { %v815_v36 = vpop.f32.mrb[46].mxu0  ;;  %v1988_v55 = vpack.c.bf16 %v943_v32, %v941_v31  ;;  %v913_v26 = vadd.f32 %v878_v49, %v812_v33  ;;  %v2703_v33 = vld [vmem:[%s2950_s4 + $0x10] sm:$0xff]  ;;  %v2709_v49 = vld [vmem:[%s2950_s4 + $0x18] sm:$0xff] }
 0x30a   :  { %v816_v58 = vadd.f32 %v815_v36, %v609_v35  ;;  %v817_v14 = vpop.f32.mrb[47].mxu0  ;;  %v944_v6 = vmax.f32 %v912_v52, 0.0 }
 0x30b   :  { %v818_v60 = vadd.f32 %v817_v14, %v610_v54  ;;  %1989 = vmatprep.subr.bf16.mxu1 %v1988_v55  ;;  %v945_v12 = vmax.f32 %v913_v26, 0.0  ;;  %1214 = vperm.xlu1 %2111, %v2703_v33   ;;  %v2715_v14 = vld [vmem:[%s2950_s4 + $0x20] sm:$0xff]  ;;  %v2721_v26 = vld [vmem:[%s2950_s4 + $0x28] sm:$0xff] }
 0x30c   :  { %v914_v37 = vadd.f32 %v882_v59, %v816_v58  ;;  %1991 = vmatpush1.bf16.msra.mxu1 %v1990_v38  ;;  %1218 = vperm.xlu0 %2110, %v2709_v49  }
 0x30d   :  { %v915_v61 = vadd.f32 %v882_v59, %v818_v60  ;;  %v962_v59 = vpop.permute.xlu1 %961 }
 0x30e   :  { %v946_v51 = vmax.f32 %v914_v37, 0.0 }
 0x30f   :  { %v947_v43 = vmax.f32 %v915_v61, 0.0  ;;  %1222 = vperm.xlu1 %2111, %v2715_v14  }
 0x310   :  { %v1994_v56 = vpack.c.bf16 %v946_v51, %v944_v6  ;;  %1226 = vperm.xlu0 %2110, %v2721_v26  }
 0x311   :  { %v1992_v10 = vpack.c.bf16 %v947_v43, %v945_v12 }
 0x313   :  { %1993 = vmatprep.subr.bf16.mxu1 %v1992_v10  ;;  %v2733_v10 = vld [vmem:[%s2950_s4 + $0x38] sm:$0xff] }
 0x314   :  { %1995 = vmatpush1.bf16.msra.mxu1 %v1994_v56  ;;  %v2727_v56 = vld [vmem:[%s2950_s4 + $0x30] sm:$0xff]  ;;  %1234 = vperm.xlu0 %2110, %v2733_v10  }
 0x315   :  { %1230 = vperm.xlu1 %2111, %v2727_v56  }
 0x317   :  { %1077 = vmatmul.mubr.f32.vlgmr.msra.gmra.mrb[16].mxu1 %v63_v57 }
 0x318   :  { %1082 = vmatprep.mubr.f32.mxu1 %v2160_v3  ;;  %1242 = vperm.xlu0 %2110, %v2382_v44  }
 0x31b   :  { %1083 = vmatmul.mubr.f32.gmra.mrb[18].mxu1 %v64_v2 }
 0x31c   :  { %1088 = vmatprep.mubr.f32.mxu1 %v2160_v3  ;;  %1250 = vperm.xlu0 %2110, %v2413_v24  }
 0x31f   :  { %1089 = vmatmul.mubr.f32.gmra.mrb[20].mxu1 %v65_v40 }
 0x320   :  { %1094 = vmatprep.mubr.f32.mxu1 %v2160_v3  ;;  %1258 = vperm.xlu0 %2110, %v2398_v53  }
 0x323   :  { %1095 = vmatmul.mubr.f32.gmra.mrb[22].mxu1 %v66_v13 }
 0x324   :  { %1100 = vmatprep.mubr.f32.mxu1 %v2160_v3  ;;  %1266 = vperm.xlu0 %2110, %v2427_v34  }
 0x327   :  { %1101 = vmatmul.mubr.f32.gmra.mrb[24].mxu1 %v67_v0 }
 0x328   :  { %1106 = vmatprep.mubr.f32.mxu1 %v2160_v3 }
 0x32b   :  { %1107 = vmatmul.mubr.f32.gmra.mrb[26].mxu1 %v68_v1  ;;  %v966_v1 = vpop.permute.xlu0 %965 }
 0x32c   :  { %1112 = vmatprep.mubr.f32.mxu1 %v2160_v3 }
 0x32f   :  { %1113 = vmatmul.mubr.f32.gmra.mrb[28].mxu1 %v69_v16  ;;  %v974_v44 = vpop.permute.xlu0 %973 }
 0x330   :  { %1118 = vmatprep.mubr.f32.mxu1 %v2160_v3 }
 0x333   :  { %1119 = vmatmul.mubr.f32.gmra.mrb[30].mxu1 %v70_v42  ;;  %v982_v53 = vpop.permute.xlu0 %981 }
 0x334   :  { %1124 = vmatprep.mubr.f32.mxu1 %v2160_v3 }
 0x337   :  { %1125 = vmatmul.mubr.f32.gmra.mrb[32].mxu1 %v71_v48  ;;  %v2739_v48 = vld [vmem:[%s2950_s4 + $0x40] sm:$0xff] }
 0x338   :  { %1130 = vmatprep.mubr.f32.mxu1 %v2160_v3  ;;  %1238 = vperm.xlu1 %2111, %v2739_v48  }
 0x33b   :  { %1131 = vmatmul.mubr.f32.gmra.mrb[34].mxu1 %v72_v17  ;;  %v970_v17 = vpop.permute.xlu1 %969 }
 0x33c   :  { %1136 = vmatprep.mubr.f32.mxu1 %v2160_v3  ;;  %1246 = vperm.xlu1 %2111, %v2390_v47  }
 0x33f   :  { %1137 = vmatmul.mubr.f32.gmra.mrb[36].mxu1 %v73_v18 }
 0x340   :  { %1142 = vmatprep.mubr.f32.mxu1 %v2160_v3  ;;  %1254 = vperm.xlu1 %2111, %v2418_v25  }
 0x343   :  { %1143 = vmatmul.mubr.f32.gmra.mrb[38].mxu1 %v74_v19 }
 0x344   :  { %1148 = vmatprep.mubr.f32.mxu1 %v2160_v3  ;;  %1262 = vperm.xlu1 %2111, %v2405_v63  }
 0x347   :  { %1149 = vmatmul.mubr.f32.gmra.mrb[40].mxu1 %v75_v39 }
 0x348   :  { %1154 = vmatprep.mubr.f32.mxu1 %v2160_v3 }
 0x34b   :  { %1155 = vmatmul.mubr.f32.gmra.mrb[42].mxu1 %v76_v20 }
 0x34c   :  { %1160 = vmatprep.mubr.f32.mxu1 %v2160_v3 }
 0x34f   :  { %1161 = vmatmul.mubr.f32.gmra.mrb[44].mxu1 %v77_v62 }
 0x350   :  { %1166 = vmatprep.mubr.f32.mxu1 %v2160_v3 }
 0x353   :  { %1167 = vmatmul.mubr.f32.gmra.mrb[46].mxu1 %v78_v41 }
 0x354   :  { %1596 = vmatprep.mubr.f32.mxu1 %v2160_v3 }
 0x3ea   :  { %v1078_v9 = vpop.f32.mrb[16].mxu1 }
 0x3eb   :  { %v1080_v21 = vpop.f32.mrb[17].mxu1  ;;  %v1079_v15 = vadd.f32 %v1078_v9, %v950_v45 }
 0x3ec   :  { %v1081_v28 = vadd.f32 %v1080_v21, %v950_v45 }
 0x3ed   :  { %v1173_v31 = vmax.f32 %v1079_v15, 0.0 }
 0x3ee   :  { %v1084_v29 = vpop.f32.mrb[18].mxu1  ;;  %v1174_v35 = vmax.f32 %v1081_v28, 0.0 }
 0x3ef   :  { %v1085_v7 = vadd.f32 %v1084_v29, %v954_v5  ;;  %v1086_v11 = vpop.f32.mrb[19].mxu1 }
 0x3f0   :  { %v1087_v30 = vadd.f32 %v1086_v11, %v954_v5 }
 0x3f1   :  { %v1175_v32 = vmax.f32 %v1085_v7, 0.0  ;;  %v978_v7 = vpop.permute.xlu1 %977 }
 0x3f2   :  { %v1176_v38 = vmax.f32 %v1087_v30, 0.0  ;;  %v1090_v54 = vpop.f32.mrb[20].mxu1 }
 0x3f3   :  { %v1998_v36 = vpack.c.bf16 %v1175_v32, %v1173_v31  ;;  %v1092_v55 = vpop.f32.mrb[21].mxu1  ;;  %v1091_v58 = vadd.f32 %v1090_v54, %v958_v23 }
 0x3f4   :  { %v1996_v52 = vpack.c.bf16 %v1176_v38, %v1174_v35  ;;  %v1093_v60 = vadd.f32 %v1092_v55, %v958_v23 }
 0x3f5   :  { %v1177_v12 = vmax.f32 %v1091_v58, 0.0  ;;  %v986_v58 = vpop.permute.xlu1 %985 }
 0x3f6   :  { %v1096_v37 = vpop.f32.mrb[22].mxu1  ;;  %1997 = vmatprep.subr.bf16.mxu0 %v1996_v52  ;;  %v1178_v57 = vmax.f32 %v1093_v60, 0.0 }
 0x3f7   :  { %v1097_v61 = vadd.f32 %v1096_v37, %v962_v59  ;;  %v1098_v6 = vpop.f32.mrb[23].mxu1  ;;  %1999 = vmatpush1.bf16.msra.mxu0 %v1998_v36 }
 0x3f8   :  { %v1099_v51 = vadd.f32 %v1098_v6, %v962_v59 }
 0x3f9   :  { %v1179_v43 = vmax.f32 %v1097_v61, 0.0 }
 0x3fa   :  { %v1180_v2 = vmax.f32 %v1099_v51, 0.0  ;;  %v1102_v40 = vpop.f32.mrb[24].mxu1 }
 0x3fb   :  { %v2002_v13 = vpack.c.bf16 %v1179_v43, %v1177_v12  ;;  %v1104_v0 = vpop.f32.mrb[25].mxu1  ;;  %v1103_v42 = vadd.f32 %v1102_v40, %v966_v1  ;;  %v990_v40 = vpop.permute.xlu0 %989 }
 0x3fc   :  { %v2000_v16 = vpack.c.bf16 %v1180_v2, %v1178_v57  ;;  %v1105_v18 = vadd.f32 %v1104_v0, %v966_v1  ;;  %v994_v1 = vpop.permute.xlu1 %993 }
 0x3fd   :  { %v1181_v41 = vmax.f32 %v1103_v42, 0.0 }
 0x3fe   :  { %v1108_v19 = vpop.f32.mrb[26].mxu1  ;;  %2001 = vmatprep.subr.bf16.mxu0 %v2000_v16  ;;  %v1182_v9 = vmax.f32 %v1105_v18, 0.0 }
 0x3ff   :  { %v1109_v39 = vadd.f32 %v1108_v19, %v970_v17  ;;  %v1110_v20 = vpop.f32.mrb[27].mxu1  ;;  %2003 = vmatpush1.bf16.msra.mxu0 %v2002_v13 }
 0x400   :  { %v1111_v62 = vadd.f32 %v1110_v20, %v970_v17 }
 0x401   :  { %v1183_v45 = vmax.f32 %v1109_v39, 0.0 }
 0x402   :  { %v1184_v21 = vmax.f32 %v1111_v62, 0.0  ;;  %v1114_v5 = vpop.f32.mrb[28].mxu1 }
 0x403   :  { %v2006_v22 = vpack.c.bf16 %v1183_v45, %v1181_v41  ;;  %v1116_v15 = vpop.f32.mrb[29].mxu1  ;;  %v1115_v29 = vadd.f32 %v1114_v5, %v974_v44  ;;  %v998_v5 = vpop.permute.xlu0 %997 }
 0x404   :  { %v2004_v28 = vpack.c.bf16 %v1184_v21, %v1182_v9  ;;  %v1117_v11 = vadd.f32 %v1116_v15, %v974_v44  ;;  %v1002_v44 = vpop.permute.xlu1 %1001 }
 0x405   :  { %v1185_v31 = vmax.f32 %v1115_v29, 0.0 }
 0x406   :  { %v1120_v23 = vpop.f32.mrb[30].mxu1  ;;  %2005 = vmatprep.subr.bf16.mxu0 %v2004_v28  ;;  %v1186_v35 = vmax.f32 %v1117_v11, 0.0 }
 0x407   :  { %v1121_v30 = vadd.f32 %v1120_v23, %v978_v7  ;;  %v1122_v47 = vpop.f32.mrb[31].mxu1  ;;  %2007 = vmatpush1.bf16.msra.mxu0 %v2006_v22 }
 0x408   :  { %v1123_v24 = vadd.f32 %v1122_v47, %v978_v7 }
 0x409   :  { %v1187_v32 = vmax.f32 %v1121_v30, 0.0 }
 0x40a   :  { %v1188_v38 = vmax.f32 %v1123_v24, 0.0  ;;  %v1126_v54 = vpop.f32.mrb[32].mxu1 }
 0x40b   :  { %v2010_v25 = vpack.c.bf16 %v1187_v32, %v1185_v31  ;;  %v1128_v36 = vpop.f32.mrb[33].mxu1  ;;  %v1127_v52 = vadd.f32 %v1126_v54, %v982_v53  ;;  %v1006_v54 = vpop.permute.xlu0 %1005 }
 0x40c   :  { %v2008_v55 = vpack.c.bf16 %v1188_v38, %v1186_v35  ;;  %v1129_v59 = vadd.f32 %v1128_v36, %v982_v53  ;;  %v1010_v53 = vpop.permute.xlu1 %1009 }
 0x40d   :  { %v1189_v51 = vmax.f32 %v1127_v52, 0.0 }
 0x40e   :  { %v1132_v60 = vpop.f32.mrb[34].mxu1  ;;  %2009 = vmatprep.subr.bf16.mxu0 %v2008_v55  ;;  %v1190_v12 = vmax.f32 %v1129_v59, 0.0 }
 0x40f   :  { %v1133_v37 = vadd.f32 %v1132_v60, %v986_v58  ;;  %v1134_v61 = vpop.f32.mrb[35].mxu1  ;;  %2011 = vmatpush1.bf16.msra.mxu0 %v2010_v25 }
 0x410   :  { %v1135_v6 = vadd.f32 %v1134_v61, %v986_v58 }
 0x411   :  { %v1191_v63 = vmax.f32 %v1133_v37, 0.0 }
 0x412   :  { %v1192_v34 = vmax.f32 %v1135_v6, 0.0  ;;  %v1138_v43 = vpop.f32.mrb[36].mxu1 }
 0x413   :  { %v2014_v57 = vpack.c.bf16 %v1191_v63, %v1189_v51  ;;  %v1140_v2 = vpop.f32.mrb[37].mxu1  ;;  %v1139_v0 = vadd.f32 %v1138_v43, %v990_v40  ;;  %v80_v43 = vld [vmem:[%s2949_s3 + $0x88] sm:$0xff] }
 0x414   :  { %v2012_v13 = vpack.c.bf16 %v1192_v34, %v1190_v12  ;;  %v1141_v16 = vadd.f32 %v1140_v2, %v990_v40  ;;  %v79_v34 = vld [vmem:[%s2949_s3 + $0x80] sm:$0xff]  ;;  %v82_v2 = vld [vmem:[%s2949_s3 + $0x98] sm:$0xff] }
 0x415   :  { %v1193_v39 = vmax.f32 %v1139_v0, 0.0  ;;  %v83_v40 = vld [vmem:[%s2949_s3 + $0xa0] sm:$0xff]  ;;  %v85_v0 = vld [vmem:[%s2949_s3 + $0xb0] sm:$0xff] }
 0x416   :  { %v1144_v42 = vpop.f32.mrb[38].mxu1  ;;  %2013 = vmatprep.subr.bf16.mxu0 %v2012_v13  ;;  %v1194_v62 = vmax.f32 %v1141_v16, 0.0  ;;  %v84_v13 = vld [vmem:[%s2949_s3 + $0xa8] sm:$0xff]  ;;  %v87_v16 = vld [vmem:[%s2949_s3 + $0xc0] sm:$0xff] }
 0x417   :  { %v1145_v17 = vadd.f32 %v1144_v42, %v994_v1  ;;  %v1146_v18 = vpop.f32.mrb[39].mxu1  ;;  %2015 = vmatpush1.bf16.msra.mxu0 %v2014_v57  ;;  %v81_v57 = vld [vmem:[%s2949_s3 + $0x90] sm:$0xff]  ;;  %v88_v42 = vld [vmem:[%s2949_s3 + $0xc8] sm:$0xff] }
 0x418   :  { %v1147_v19 = vadd.f32 %v1146_v18, %v994_v1  ;;  %v86_v1 = vld [vmem:[%s2949_s3 + $0xb8] sm:$0xff] }
 0x419   :  { %v1195_v20 = vmax.f32 %v1145_v17, 0.0  ;;  %v89_v17 = vld [vmem:[%s2949_s3 + $0xd0] sm:$0xff]  ;;  %v90_v18 = vld [vmem:[%s2949_s3 + $0xd8] sm:$0xff] }
 0x41a   :  { %v1196_v41 = vmax.f32 %v1147_v19, 0.0  ;;  %v1150_v45 = vpop.f32.mrb[40].mxu1  ;;  %v91_v19 = vld [vmem:[%s2949_s3 + $0xe0] sm:$0xff] }
 0x41b   :  { %v2018_v9 = vpack.c.bf16 %v1195_v20, %v1193_v39  ;;  %v1152_v21 = vpop.f32.mrb[41].mxu1  ;;  %v1151_v15 = vadd.f32 %v1150_v45, %v998_v5  ;;  %v92_v39 = vld [vmem:[%s2949_s3 + $0xe8] sm:$0xff]  ;;  %v93_v20 = vld [vmem:[%s2949_s3 + $0xf0] sm:$0xff]  ;;  %v2168_v45 = vmov 7  }
 0x41c   :  { %v2016_v22 = vpack.c.bf16 %v1196_v41, %v1194_v62  ;;  %v1153_v28 = vadd.f32 %v1152_v21, %v998_v5  ;;  %v94_v62 = vld [vmem:[%s2949_s3 + $0xf8] sm:$0xff]  ;;  %v2167_v41 = vmov 6  }
 0x41d   :  { %v1197_v30 = vmax.f32 %v1151_v15, 0.0  ;;  %2112 = vset.pattern.permute.xlu1 %v2167_v41  ;;  %2113 = vset.pattern.permute.xlu0 %v2167_v41 }
 0x41e   :  { %v1156_v29 = vpop.f32.mrb[42].mxu1  ;;  %2017 = vmatprep.subr.bf16.mxu0 %v2016_v22  ;;  %v1198_v24 = vmax.f32 %v1153_v28, 0.0  ;;  %1463 = vperm.xlu1 %2112, %v2697_v27  }
 0x41f   :  { %v1157_v7 = vadd.f32 %v1156_v29, %v1002_v44  ;;  %v1158_v11 = vpop.f32.mrb[43].mxu1  ;;  %2019 = vmatpush1.bf16.msra.mxu0 %v2018_v9  ;;  %1467 = vperm.xlu0 %2113, %v2691_v8   ;;  %v1207_v9 = vpop.permute.xlu0 %1206 }
 0x420   :  { %v1159_v23 = vadd.f32 %v1158_v11, %v1002_v44 }
 0x421   :  { %v1199_v47 = vmax.f32 %v1157_v7, 0.0 }
 0x422   :  { %v1200_v31 = vmax.f32 %v1159_v23, 0.0  ;;  %v1162_v32 = vpop.f32.mrb[44].mxu1  ;;  %1471 = vperm.xlu1 %2112, %v2703_v33  }
 0x423   :  { %v2022_v35 = vpack.c.bf16 %v1199_v47, %v1197_v30  ;;  %v1164_v38 = vpop.f32.mrb[45].mxu1  ;;  %v1163_v36 = vadd.f32 %v1162_v32, %v1006_v54  ;;  %2114 = vset.pattern.permute.xlu0 %v2168_v45 }
 0x424   :  { %v2020_v25 = vpack.c.bf16 %v1200_v31, %v1198_v24  ;;  %v1165_v55 = vadd.f32 %v1164_v38, %v1006_v54  ;;  %1720 = vperm.xlu0 %2114, %v2697_v27   ;;  %v1211_v27 = vpop.permute.xlu1 %1210  ;;  %v1219_v31 = vpop.permute.xlu0 %1218 }
 0x425   :  { %v1201_v37 = vmax.f32 %v1163_v36, 0.0 }
 0x426   :  { %v1168_v52 = vpop.f32.mrb[46].mxu1  ;;  %2021 = vmatprep.subr.bf16.mxu0 %v2020_v25  ;;  %v1202_v6 = vmax.f32 %v1165_v55, 0.0  ;;  %1475 = vperm.xlu1 %2112, %v2709_v49  }
 0x427   :  { %v1169_v58 = vadd.f32 %v1168_v52, %v1010_v53  ;;  %v1170_v59 = vpop.f32.mrb[47].mxu1  ;;  %2023 = vmatpush1.bf16.msra.mxu0 %v2022_v35 }
 0x428   :  { %v1171_v60 = vadd.f32 %v1170_v59, %v1010_v53  ;;  %1728 = vperm.xlu0 %2114, %v2703_v33   ;;  %v1215_v29 = vpop.permute.xlu1 %1214 }
 0x429   :  { %v1203_v61 = vmax.f32 %v1169_v58, 0.0 }
 0x42a   :  { %v1204_v51 = vmax.f32 %v1171_v60, 0.0  ;;  %2115 = vset.pattern.permute.xlu1 %v2168_v45 }
 0x42b   :  { %v2026_v63 = vpack.c.bf16 %v1203_v61, %v1201_v37  ;;  %1724 = vperm.xlu1 %2115, %v2691_v8   ;;  %v2130_v61 = vld [vmem:[%s2950_s4 + $0x50] sm:$0xff] }
 0x42c   :  { %v2024_v12 = vpack.c.bf16 %v1204_v51, %v1202_v6  ;;  %1732 = vperm.xlu0 %2114, %v2709_v49   ;;  %v1223_v60 = vpop.permute.xlu1 %1222  ;;  %v1227_v51 = vpop.permute.xlu0 %1226 }
 0x42e   :  { %2025 = vmatprep.subr.bf16.mxu0 %v2024_v12 }
 0x42f   :  { %2027 = vmatpush1.bf16.msra.mxu0 %v2026_v63  ;;  %2116 = vset.pattern.permute.xlu1 %v2167_v41 }
 0x430   :  { %1479 = vperm.xlu1 %2116, %v2715_v14   ;;  %1736 = vperm.xlu0 %2114, %v2715_v14  }
 0x432   :  { %1334 = vmatmul.mubr.f32.vlgmr.msra.gmra.mrb[48].mxu0 %v79_v34 }
 0x433   :  { %1339 = vmatprep.mubr.f32.mxu0 %v2160_v3 }
 0x434   :  { %1483 = vperm.xlu1 %2116, %v2721_v26   ;;  %1740 = vperm.xlu0 %2114, %v2721_v26  }
 0x436   :  { %1340 = vmatmul.mubr.f32.gmra.mrb[50].mxu0 %v80_v43 }
 0x437   :  { %1345 = vmatprep.mubr.f32.mxu0 %v2160_v3 }
 0x438   :  { %1487 = vperm.xlu1 %2116, %v2727_v56   ;;  %1744 = vperm.xlu0 %2114, %v2727_v56  }
 0x43a   :  { %1346 = vmatmul.mubr.f32.gmra.mrb[52].mxu0 %v81_v57 }
 0x43b   :  { %1351 = vmatprep.mubr.f32.mxu0 %v2160_v3 }
 0x43c   :  { %1491 = vperm.xlu1 %2116, %v2733_v10   ;;  %1748 = vperm.xlu0 %2114, %v2733_v10   ;;  %v2129_v10 = vld [vmem:[%s2950_s4 + $0x48] sm:$0xff] }
 0x43e   :  { %1352 = vmatmul.mubr.f32.gmra.mrb[54].mxu0 %v82_v2  ;;  %v2131_v2 = vld [vmem:[%s2950_s4 + $0x58] sm:$0xff] }
 0x43f   :  { %1357 = vmatprep.mubr.f32.mxu0 %v2160_v3 }
 0x440   :  { %1495 = vperm.xlu1 %2116, %v2739_v48   ;;  %1752 = vperm.xlu0 %2114, %v2739_v48  }
 0x442   :  { %1358 = vmatmul.mubr.f32.gmra.mrb[56].mxu0 %v83_v40 }
 0x443   :  { %1363 = vmatprep.mubr.f32.mxu0 %v2160_v3 }
 0x444   :  { %1499 = vperm.xlu1 %2116, %v2129_v10   ;;  %1756 = vperm.xlu0 %2114, %v2129_v10  }
 0x446   :  { %1364 = vmatmul.mubr.f32.gmra.mrb[58].mxu0 %v84_v13 }
 0x447   :  { %1369 = vmatprep.mubr.f32.mxu0 %v2160_v3 }
 0x448   :  { %1503 = vperm.xlu1 %2116, %v2130_v61   ;;  %1760 = vperm.xlu0 %2114, %v2130_v61  }
 0x44a   :  { %1370 = vmatmul.mubr.f32.gmra.mrb[60].mxu0 %v85_v0 }
 0x44b   :  { %1375 = vmatprep.mubr.f32.mxu0 %v2160_v3 }
 0x44c   :  { %1507 = vperm.xlu1 %2116, %v2131_v2   ;;  %1764 = vperm.xlu0 %2114, %v2131_v2  }
 0x44e   :  { %1376 = vmatmul.mubr.f32.gmra.mrb[62].mxu0 %v86_v1 }
 0x44f   :  { %1381 = vmatprep.mubr.f32.mxu0 %v2160_v3 }
 0x452   :  { %1382 = vmatmul.mubr.f32.gmra.mrb[64].mxu0 %v87_v16 }
 0x453   :  { %1387 = vmatprep.mubr.f32.mxu0 %v2160_v3 }
 0x456   :  { %1388 = vmatmul.mubr.f32.gmra.mrb[66].mxu0 %v88_v42 }
 0x457   :  { %1393 = vmatprep.mubr.f32.mxu0 %v2160_v3 }
 0x45a   :  { %1394 = vmatmul.mubr.f32.gmra.mrb[68].mxu0 %v89_v17 }
 0x45b   :  { %1399 = vmatprep.mubr.f32.mxu0 %v2160_v3 }
 0x45e   :  { %1400 = vmatmul.mubr.f32.gmra.mrb[70].mxu0 %v90_v18  ;;  %v1231_v18 = vpop.permute.xlu1 %1230 }
 0x45f   :  { %1405 = vmatprep.mubr.f32.mxu0 %v2160_v3 }
 0x462   :  { %1406 = vmatmul.mubr.f32.gmra.mrb[72].mxu0 %v91_v19 }
 0x463   :  { %1411 = vmatprep.mubr.f32.mxu0 %v2160_v3 }
 0x466   :  { %1412 = vmatmul.mubr.f32.gmra.mrb[74].mxu0 %v92_v39  ;;  %v2132_v39 = vld [vmem:[%s2950_s4 + $0x60] sm:$0xff] }
 0x467   :  { %1417 = vmatprep.mubr.f32.mxu0 %v2160_v3  ;;  %1511 = vperm.xlu1 %2116, %v2132_v39  }
 0x468   :  { %1768 = vperm.xlu0 %2114, %v2132_v39  }
 0x46a   :  { %1418 = vmatmul.mubr.f32.gmra.mrb[76].mxu0 %v93_v20 }
 0x46b   :  { %1423 = vmatprep.mubr.f32.mxu0 %v2160_v3 }
 0x46e   :  { %1424 = vmatmul.mubr.f32.gmra.mrb[78].mxu0 %v94_v62  ;;  %v1235_v62 = vpop.permute.xlu0 %1234 }
 0x46f   :  { %1590 = vmatprep.mubr.f32.mxu0 %v2160_v3 }
 0x505   :  { %v1335_v21 = vpop.f32.mrb[48].mxu0 }
 0x506   :  { %v1337_v5 = vpop.f32.mrb[49].mxu0  ;;  %v1336_v8 = vadd.f32 %v1335_v21, %v1207_v9 }
 0x507   :  { %v1338_v22 = vadd.f32 %v1337_v5, %v1207_v9 }
 0x508   :  { %v1430_v14 = vmax.f32 %v1336_v8, 0.0  ;;  %v2133_v8 = vld [vmem:[%s2950_s4 + $0x68] sm:$0xff] }
 0x509   :  { %v1341_v33 = vpop.f32.mrb[50].mxu0  ;;  %v1431_v7 = vmax.f32 %v1338_v22, 0.0  ;;  %1515 = vperm.xlu1 %2116, %v2133_v8   ;;  %1772 = vperm.xlu0 %2114, %v2133_v8  }
 0x50a   :  { %v1342_v15 = vadd.f32 %v1341_v33, %v1211_v27  ;;  %v1343_v44 = vpop.f32.mrb[51].mxu0 }
 0x50b   :  { %v1344_v49 = vadd.f32 %v1343_v44, %v1211_v27 }
 0x50c   :  { %v1432_v28 = vmax.f32 %v1342_v15, 0.0 }
 0x50d   :  { %v1433_v11 = vmax.f32 %v1344_v49, 0.0  ;;  %v1347_v23 = vpop.f32.mrb[52].mxu0 }
 0x50e   :  { %v2030_v26 = vpack.c.bf16 %v1432_v28, %v1430_v14  ;;  %v1349_v30 = vpop.f32.mrb[53].mxu0  ;;  %v1348_v24 = vadd.f32 %v1347_v23, %v1215_v29 }
 0x50f   :  { %v2028_v47 = vpack.c.bf16 %v1433_v11, %v1431_v7  ;;  %v1350_v32 = vadd.f32 %v1349_v30, %v1215_v29  ;;  %v1239_v29 = vpop.permute.xlu1 %1238  ;;  %v2134_v11 = vld [vmem:[%s2950_s4 + $0x70] sm:$0xff] }
 0x510   :  { %v1434_v25 = vmax.f32 %v1348_v24, 0.0  ;;  %1519 = vperm.xlu1 %2116, %v2134_v11  }
 0x511   :  { %v1353_v56 = vpop.f32.mrb[54].mxu0  ;;  %2029 = vmatprep.subr.bf16.mxu0 %v2028_v47  ;;  %2060 = vmatprep.subr.bf16.mxu1 %v2028_v47  ;;  %v1435_v53 = vmax.f32 %v1350_v32, 0.0 }
 0x512   :  { %v1354_v35 = vadd.f32 %v1353_v56, %v1219_v31  ;;  %v1355_v38 = vpop.f32.mrb[55].mxu0  ;;  %2031 = vmatpush1.bf16.msra.mxu0 %v2030_v26  ;;  %2068 = vmatpush1.bf16.msra.mxu1 %v2030_v26  ;;  %v1243_v26 = vpop.permute.xlu0 %1242  ;;  %v2135_v56 = vld [vmem:[%s2950_s4 + $0x78] sm:$0xff] }
 0x513   :  { %v1356_v54 = vadd.f32 %v1355_v38, %v1219_v31  ;;  %1780 = vperm.xlu0 %2114, %v2135_v56  }
 0x514   :  { %v1436_v36 = vmax.f32 %v1354_v35, 0.0  ;;  %1523 = vperm.xlu1 %2116, %v2135_v56   ;;  %v101_v56 = vld [vmem:[%s2949_s3 + $0x130] sm:$0xff] }
 0x515   :  { %v1437_v55 = vmax.f32 %v1356_v54, 0.0  ;;  %v1359_v52 = vpop.f32.mrb[56].mxu0 }
 0x516   :  { %v2034_v58 = vpack.c.bf16 %v1436_v36, %v1434_v25  ;;  %v1361_v59 = vpop.f32.mrb[57].mxu0  ;;  %v1360_v6 = vadd.f32 %v1359_v52, %v1223_v60 }
 0x517   :  { %v2032_v37 = vpack.c.bf16 %v1437_v55, %v1435_v53  ;;  %v1362_v63 = vadd.f32 %v1361_v59, %v1223_v60  ;;  %v1247_v55 = vpop.permute.xlu1 %1246  ;;  %2119 = vset.pattern.permute.xlu0 %v2161_v4  ;;  %v1251_v59 = vpop.permute.xlu0 %1250 }
 0x518   :  { %v1438_v40 = vmax.f32 %v1360_v6, 0.0  ;;  %2117 = vset.pattern.permute.xlu1 %v2168_v45 }
 0x519   :  { %v1365_v12 = vpop.f32.mrb[58].mxu0  ;;  %2033 = vmatprep.subr.bf16.mxu0 %v2032_v37  ;;  %2061 = vmatprep.subr.bf16.mxu1 %v2032_v37  ;;  %v1439_v0 = vmax.f32 %v1362_v63, 0.0 }
 0x51a   :  { %v1366_v34 = vadd.f32 %v1365_v12, %v1227_v51  ;;  %v1367_v43 = vpop.f32.mrb[59].mxu0  ;;  %2035 = vmatpush1.bf16.msra.mxu0 %v2034_v58  ;;  %2069 = vmatpush1.bf16.msra.mxu1 %v2034_v58 }
 0x51b   :  { %v1368_v57 = vadd.f32 %v1367_v43, %v1227_v51  ;;  %1776 = vperm.xlu1 %2117, %v2134_v11  }
 0x51c   :  { %v1440_v13 = vmax.f32 %v1366_v34, 0.0 }
 0x51d   :  { %v1441_v1 = vmax.f32 %v1368_v57, 0.0  ;;  %v1371_v16 = vpop.f32.mrb[60].mxu0 }
 0x51e   :  { %v2038_v42 = vpack.c.bf16 %v1440_v13, %v1438_v40  ;;  %v1373_v17 = vpop.f32.mrb[61].mxu0  ;;  %v1372_v20 = vadd.f32 %v1371_v16, %v1231_v18  ;;  %v1255_v40 = vpop.permute.xlu1 %1254 }
 0x51f   :  { %v2036_v19 = vpack.c.bf16 %v1441_v1, %v1439_v0  ;;  %v1374_v41 = vadd.f32 %v1373_v17, %v1231_v18  ;;  %2118 = vset.pattern.permute.xlu1 %v2161_v4  ;;  %v1259_v1 = vpop.permute.xlu0 %1258 }
 0x520   :  { %v1442_v22 = vmax.f32 %v1372_v20, 0.0  ;;  %1858 = vperm.xlu1 %2118, %v2739_v48  }
 0x521   :  { %v1377_v9 = vpop.f32.mrb[62].mxu0  ;;  %2037 = vmatprep.subr.bf16.mxu0 %v2036_v19  ;;  %2062 = vmatprep.subr.bf16.mxu1 %v2036_v19  ;;  %v1443_v15 = vmax.f32 %v1374_v41, 0.0 }
 0x522   :  { %v1378_v21 = vadd.f32 %v1377_v9, %v1235_v62  ;;  %v1379_v5 = vpop.f32.mrb[63].mxu0  ;;  %2039 = vmatpush1.bf16.msra.mxu0 %v2038_v42  ;;  %2070 = vmatpush1.bf16.msra.mxu1 %v2038_v42 }
 0x523   :  { %v1380_v27 = vadd.f32 %v1379_v5, %v1235_v62  ;;  %v1267_v8 = vpop.permute.xlu0 %1266 }
 0x524   :  { %v1444_v33 = vmax.f32 %v1378_v21, 0.0  ;;  %v1263_v21 = vpop.permute.xlu1 %1262 }
 0x525   :  { %v1445_v44 = vmax.f32 %v1380_v27, 0.0  ;;  %v1383_v49 = vpop.f32.mrb[64].mxu0 }
 0x526   :  { %v2042_v14 = vpack.c.bf16 %v1444_v33, %v1442_v22  ;;  %v1385_v28 = vpop.f32.mrb[65].mxu0  ;;  %v1384_v23 = vadd.f32 %v1383_v49, %v1239_v29 }
 0x527   :  { %v2040_v7 = vpack.c.bf16 %v1445_v44, %v1443_v15  ;;  %v1386_v30 = vadd.f32 %v1385_v28, %v1239_v29 }
 0x528   :  { %v1446_v35 = vmax.f32 %v1384_v23, 0.0 }
 0x529   :  { %v1389_v47 = vpop.f32.mrb[66].mxu0  ;;  %2041 = vmatprep.subr.bf16.mxu0 %v2040_v7  ;;  %2063 = vmatprep.subr.bf16.mxu1 %v2040_v7  ;;  %v1447_v54 = vmax.f32 %v1386_v30, 0.0  ;;  %v96_v30 = vld [vmem:[%s2949_s3 + $0x108] sm:$0xff] }
 0x52a   :  { %v1390_v24 = vadd.f32 %v1389_v47, %v1243_v26  ;;  %v1391_v31 = vpop.f32.mrb[67].mxu0  ;;  %2043 = vmatpush1.bf16.msra.mxu0 %v2042_v14  ;;  %2071 = vmatpush1.bf16.msra.mxu1 %v2042_v14  ;;  %v97_v47 = vld [vmem:[%s2949_s3 + $0x110] sm:$0xff] }
 0x52b   :  { %v1392_v32 = vadd.f32 %v1391_v31, %v1243_v26  ;;  %v95_v26 = vld [vmem:[%s2949_s3 + $0x100] sm:$0xff] }
 0x52c   :  { %v1448_v38 = vmax.f32 %v1390_v24, 0.0  ;;  %v98_v24 = vld [vmem:[%s2949_s3 + $0x118] sm:$0xff]  ;;  %v99_v31 = vld [vmem:[%s2949_s3 + $0x120] sm:$0xff] }
 0x52d   :  { %v1449_v10 = vmax.f32 %v1392_v32, 0.0  ;;  %v1395_v25 = vpop.f32.mrb[68].mxu0  ;;  %v100_v32 = vld [vmem:[%s2949_s3 + $0x128] sm:$0xff] }
 0x52e   :  { %v2046_v36 = vpack.c.bf16 %v1448_v38, %v1446_v35  ;;  %v1397_v53 = vpop.f32.mrb[69].mxu0  ;;  %v1396_v58 = vadd.f32 %v1395_v25, %v1247_v55  ;;  %v102_v35 = vld [vmem:[%s2949_s3 + $0x138] sm:$0xff]  ;;  %v103_v38 = vld [vmem:[%s2949_s3 + $0x140] sm:$0xff] }
 0x52f   :  { %v2044_v52 = vpack.c.bf16 %v1449_v10, %v1447_v54  ;;  %v1398_v60 = vadd.f32 %v1397_v53, %v1247_v55  ;;  %v104_v54 = vld [vmem:[%s2949_s3 + $0x148] sm:$0xff]  ;;  %v105_v10 = vld [vmem:[%s2949_s3 + $0x150] sm:$0xff]  ;;  %v106_v25 = vld [vmem:[%s2949_s3 + $0x158] sm:$0xff] }
 0x530   :  { %v1450_v63 = vmax.f32 %v1396_v58, 0.0  ;;  %v108_v53 = vld [vmem:[%s2949_s3 + $0x168] sm:$0xff]  ;;  %v109_v55 = vld [vmem:[%s2949_s3 + $0x170] sm:$0xff]  ;;  %v1464_v58 = vpop.permute.xlu1 %1463 }
 0x531   :  { %v1401_v37 = vpop.f32.mrb[70].mxu0  ;;  %2045 = vmatprep.subr.bf16.mxu0 %v2044_v52  ;;  %2064 = vmatprep.subr.bf16.mxu1 %v2044_v52  ;;  %v1451_v34 = vmax.f32 %v1398_v60, 0.0  ;;  %v110_v52 = vld [vmem:[%s2949_s3 + $0x178] sm:$0xff] }
 0x532   :  { %v1402_v61 = vadd.f32 %v1401_v37, %v1251_v59  ;;  %v1403_v6 = vpop.f32.mrb[71].mxu0  ;;  %2047 = vmatpush1.bf16.msra.mxu0 %v2046_v36  ;;  %2072 = vmatpush1.bf16.msra.mxu1 %v2046_v36  ;;  %v107_v36 = vld [vmem:[%s2949_s3 + $0x160] sm:$0xff]  ;;  %v1468_v37 = vpop.permute.xlu0 %1467  ;;  %s2170_s3 = smov [#allocation2]  }
 0x533   :  { %v1404_v51 = vadd.f32 %v1403_v6, %v1251_v59  ;;  %s1892_s24 = sshll.u32 %s2170_s3, 4  ;;  %s1893_s24 = int_to_ptr.vmem [resolvable:$true] %s1892_s24 }
 0x534   :  { %v1452_v12 = vmax.f32 %v1402_v61, 0.0  ;;  %v1472_v59 = vpop.permute.xlu1 %1471  ;;  %s2136_s0 = scalar_lea.vmem %s1893_s24, 32  ;;  %p2141_p1 = scmp.lt.s32.totalorder %s1893_s24, %s1893_s24 }
 0x535   :  { %v1453_v45 = vmax.f32 %v1404_v51, 0.0  ;;  %v1407_v43 = vpop.f32.mrb[72].mxu0  ;;  %p2137_p0 = scmp.ne.s32.totalorder %s1893_s24, %s2136_s0  ;;  %p2142_p2 = scmp.lt.s32.totalorder %s2136_s0, %s2136_s0 }
 0x536   :  { %v2050_v57 = vpack.c.bf16 %v1452_v12, %v1450_v63  ;;  %v1409_v2 = vpop.f32.mrb[73].mxu0  ;;  %v1408_v0 = vadd.f32 %v1407_v43, %v1255_v40  ;;  %v1721_v6 = vpop.permute.xlu0 %1720 }
 0x537   :  { %v2048_v13 = vpack.c.bf16 %v1453_v45, %v1451_v34  ;;  %v1410_v16 = vadd.f32 %v1409_v2, %v1255_v40  ;;  %p2143_p3 = por %p2142_p2, %p2141_p1 }
 0x538   :  { %v1454_v19 = vmax.f32 %v1408_v0, 0.0  ;;  %v1476_v60 = vpop.permute.xlu1 %1475 }
 0x539   :  { %v1413_v42 = vpop.f32.mrb[74].mxu0  ;;  %2049 = vmatprep.subr.bf16.mxu0 %v2048_v13  ;;  %2065 = vmatprep.subr.bf16.mxu1 %v2048_v13  ;;  %v1455_v20 = vmax.f32 %v1410_v16, 0.0  ;;  %p2144_p4 = pnand %p2143_p3, %p2137_p0 }
 0x53a   :  { %v1414_v17 = vadd.f32 %v1413_v42, %v1259_v1  ;;  %v1415_v18 = vpop.f32.mrb[75].mxu0  ;;  %2051 = vmatpush1.bf16.msra.mxu0 %v2050_v57  ;;  %2073 = vmatpush1.bf16.msra.mxu1 %v2050_v57  ;;  %v1729_v63 = vpop.permute.xlu0 %1728 }
 0x53b   :  { %v1416_v4 = vadd.f32 %v1415_v18, %v1259_v1 }
 0x53c   :  { %v1456_v39 = vmax.f32 %v1414_v17, 0.0  ;;  %v1725_v61 = vpop.permute.xlu1 %1724 }
 0x53d   :  { %v1457_v62 = vmax.f32 %v1416_v4, 0.0  ;;  %v1419_v48 = vpop.f32.mrb[76].mxu0 }
 0x53e   :  { %v2054_v41 = vpack.c.bf16 %v1456_v39, %v1454_v19  ;;  %v1421_v9 = vpop.f32.mrb[77].mxu0  ;;  %v1420_v27 = vadd.f32 %v1419_v48, %v1263_v21  ;;  %v1733_v34 = vpop.permute.xlu0 %1732 }
 0x53f   :  { %v2052_v5 = vpack.c.bf16 %v1457_v62, %v1455_v20  ;;  %v1422_v22 = vadd.f32 %v1421_v9, %v1263_v21 }
 0x540   :  { %v1458_v14 = vmax.f32 %v1420_v27, 0.0  ;;  %v1480_v51 = vpop.permute.xlu1 %1479 }
 0x541   :  { %v1425_v33 = vpop.f32.mrb[78].mxu0  ;;  %2053 = vmatprep.subr.bf16.mxu0 %v2052_v5  ;;  %2066 = vmatprep.subr.bf16.mxu1 %v2052_v5  ;;  %v1459_v29 = vmax.f32 %v1422_v22, 0.0 }
 0x542   :  { %v1426_v15 = vadd.f32 %v1425_v33, %v1267_v8  ;;  %v1427_v44 = vpop.f32.mrb[79].mxu0  ;;  %2055 = vmatpush1.bf16.msra.mxu0 %v2054_v41  ;;  %2074 = vmatpush1.bf16.msra.mxu1 %v2054_v41  ;;  %v1737_v43 = vpop.permute.xlu0 %1736 }
 0x543   :  { %v1428_v49 = vadd.f32 %v1427_v44, %v1267_v8 }
 0x544   :  { %v1460_v28 = vmax.f32 %v1426_v15, 0.0  ;;  %v1484_v12 = vpop.permute.xlu1 %1483 }
 0x545   :  { %v1461_v7 = vmax.f32 %v1428_v49, 0.0 }
 0x546   :  { %v2058_v11 = vpack.c.bf16 %v1460_v28, %v1458_v14  ;;  %v1741_v4 = vpop.permute.xlu0 %1740 }
 0x547   :  { %v2056_v23 = vpack.c.bf16 %v1461_v7, %v1459_v29 }
 0x548   :  { %v2920_v45 = vpop.permute.xlu1 %1487 }
 0x549   :  { %2057 = vmatprep.subr.bf16.mxu0 %v2056_v23  ;;  %2067 = vmatprep.subr.bf16.mxu1 %v2056_v23 }
 0x54a   :  { %2059 = vmatpush1.bf16.msra.mxu0 %v2058_v11  ;;  %2075 = vmatpush1.bf16.msra.mxu1 %v2058_v11  ;;  %v1745_v7 = vpop.permute.xlu0 %1744 }
 0x54c   :  { %v2922_v1 = vpop.permute.xlu1 %1491 }
 0x54d   :  { %1591 = vmatmul.mubr.f32.vlgmr.msra.gmra.mrb[80].mxu0 %v95_v26  ;;  %1597 = vmatmul.mubr.f32.vlgmr.msra.gmra.mrb[48].mxu1 %v96_v30 }
 0x54e   :  { %1602 = vmatprep.mubr.f32.mxu1 %v2160_v3 }
 0x550   :  { %v2924_v33 = vpop.permute.xlu1 %1495 }
 0x551   :  { %1603 = vmatmul.mubr.f32.gmra.mrb[50].mxu1 %v97_v47 }
 0x552   :  { %1608 = vmatprep.mubr.f32.mxu1 %v2160_v3 }
 0x555   :  { %1609 = vmatmul.mubr.f32.gmra.mrb[52].mxu1 %v98_v24 }
 0x556   :  { %1614 = vmatprep.mubr.f32.mxu1 %v2160_v3 }
 0x559   :  { %1615 = vmatmul.mubr.f32.gmra.mrb[54].mxu1 %v99_v31 }
 0x55a   :  { %1620 = vmatprep.mubr.f32.mxu1 %v2160_v3 }
 0x55d   :  { %1621 = vmatmul.mubr.f32.gmra.mrb[56].mxu1 %v100_v32 }
 0x55e   :  { %1626 = vmatprep.mubr.f32.mxu1 %v2160_v3 }
 0x561   :  { %1627 = vmatmul.mubr.f32.gmra.mrb[58].mxu1 %v101_v56 }
 0x562   :  { %1632 = vmatprep.mubr.f32.mxu1 %v2160_v3 }
 0x565   :  { %1633 = vmatmul.mubr.f32.gmra.mrb[60].mxu1 %v102_v35 }
 0x566   :  { %1638 = vmatprep.mubr.f32.mxu1 %v2160_v3 }
 0x569   :  { %1639 = vmatmul.mubr.f32.gmra.mrb[62].mxu1 %v103_v38  ;;  %v1500_v38 = vpop.permute.xlu1 %1499 }
 0x56a   :  { %1644 = vmatprep.mubr.f32.mxu1 %v2160_v3 }
 0x56d   :  { %1645 = vmatmul.mubr.f32.gmra.mrb[64].mxu1 %v104_v54 }
 0x56e   :  { %1650 = vmatprep.mubr.f32.mxu1 %v2160_v3 }
 0x571   :  { %1651 = vmatmul.mubr.f32.gmra.mrb[66].mxu1 %v105_v10 }
 0x572   :  { %1656 = vmatprep.mubr.f32.mxu1 %v2160_v3 }
 0x575   :  { %1657 = vmatmul.mubr.f32.gmra.mrb[68].mxu1 %v106_v25 }
 0x576   :  { %1662 = vmatprep.mubr.f32.mxu1 %v2160_v3 }
 0x579   :  { %1663 = vmatmul.mubr.f32.gmra.mrb[70].mxu1 %v107_v36 }
 0x57a   :  { %1668 = vmatprep.mubr.f32.mxu1 %v2160_v3 }
 0x57d   :  { %1669 = vmatmul.mubr.f32.gmra.mrb[72].mxu1 %v108_v53  ;;  %v1749_v53 = vpop.permute.xlu0 %1748 }
 0x57e   :  { %1674 = vmatprep.mubr.f32.mxu1 %v2160_v3 }
 0x581   :  { %1675 = vmatmul.mubr.f32.gmra.mrb[74].mxu1 %v109_v55 }
 0x582   :  { %1680 = vmatprep.mubr.f32.mxu1 %v2160_v3 }
 0x585   :  { %1681 = vmatmul.mubr.f32.gmra.mrb[76].mxu1 %v110_v52 }
 0x620   :  { %v1592_v57 = vpop.f32.mrb[80].mxu0  ;;  %v1598_v3 = vpop.f32.mrb[48].mxu1 }
 0x621   :  { %v1593_v2 = vadd.f32 %v1592_v57, %v1464_v58  ;;  %v1599_v40 = vadd.f32 %v1598_v3, %v1468_v37  ;;  %v1594_v13 = vpop.f32.mrb[81].mxu0  ;;  %v1600_v0 = vpop.f32.mrb[49].mxu1 }
 0x622   :  { %v1595_v16 = vadd.f32 %v1594_v13, %v1464_v58  ;;  %v1601_v42 = vadd.f32 %v1600_v0, %v1468_v37  ;;  %v1504_v3 = vpop.permute.xlu1 %1503 }
 0x623   :  { %v1687_v17 = vmax.f32 %v1593_v2, 0.0  ;;  %v1689_v18 = vmax.f32 %v1599_v40, 0.0 }
 0x624   :  { %v1688_v19 = vmax.f32 %v1595_v16, 0.0  ;;  %v1690_v39 = vmax.f32 %v1601_v42, 0.0  ;;  %v1604_v20 = vpop.f32.mrb[50].mxu1  ;;  %v1753_v16 = vpop.permute.xlu0 %1752 }
 0x625   :  { %v1783_v62 = vmul.f32 %v1721_v6, %v1687_v17  ;;  %v1785_v48 = vmul.f32 %v1725_v61, %v1689_v18  ;;  %v1605_v41 = vadd.f32 %v1604_v20, %v1472_v59  ;;  %v1606_v9 = vpop.f32.mrb[51].mxu1 }
 0x626   :  { %v1784_v21 = vmul.f32 %v1721_v6, %v1688_v19  ;;  %v1786_v5 = vmul.f32 %v1725_v61, %v1690_v39  ;;  %v1607_v27 = vadd.f32 %v1606_v9, %v1472_v59 }
 0x627   :  { %v1815_v8 = vadd.f32 %v1785_v48, %v1783_v62  ;;  %v1691_v22 = vmax.f32 %v1605_v41, 0.0  ;;  %v1508_v41 = vpop.permute.xlu1 %1507 }
 0x628   :  { %v1836_v15 = vadd.f32 %v1786_v5, %v1784_v21  ;;  %v1692_v44 = vmax.f32 %v1607_v27, 0.0  ;;  %v1610_v49 = vpop.f32.mrb[52].mxu1 }
 0x629   :  { %v1787_v14 = vmul.f32 %v1729_v63, %v1691_v22  ;;  %v1611_v28 = vadd.f32 %v1610_v49, %v1476_v60  ;;  %v1612_v29 = vpop.f32.mrb[53].mxu1 }
 0x62a   :  { %v1788_v11 = vmul.f32 %v1729_v63, %v1692_v44  ;;  %v1613_v23 = vadd.f32 %v1612_v29, %v1476_v60 }
 0x62b   :  { %v1816_v26 = vadd.f32 %v1815_v8, %v1787_v14  ;;  %v1693_v30 = vmax.f32 %v1611_v28, 0.0  ;;  %v1757_v8 = vpop.permute.xlu0 %1756 }
 0x62c   :  { %v1837_v47 = vadd.f32 %v1836_v15, %v1788_v11  ;;  %v1694_v24 = vmax.f32 %v1613_v23, 0.0  ;;  %v1616_v31 = vpop.f32.mrb[54].mxu1  ;;  %v1512_v23 = vpop.permute.xlu1 %1511 }
 0x62d   :  { %v1789_v32 = vmul.f32 %v1733_v34, %v1693_v30  ;;  %v1617_v56 = vadd.f32 %v1616_v31, %v1480_v51  ;;  %v1618_v35 = vpop.f32.mrb[55].mxu1 }
 0x62e   :  { %v1790_v54 = vmul.f32 %v1733_v34, %v1694_v24  ;;  %v1619_v10 = vadd.f32 %v1618_v35, %v1480_v51 }
 0x62f   :  { %v1817_v25 = vadd.f32 %v1816_v26, %v1789_v32  ;;  %v1695_v36 = vmax.f32 %v1617_v56, 0.0  ;;  %v1761_v31 = vpop.permute.xlu0 %1760 }
 0x630   :  { %v1838_v55 = vadd.f32 %v1837_v47, %v1790_v54  ;;  %v1696_v52 = vmax.f32 %v1619_v10, 0.0  ;;  %v1622_v58 = vpop.f32.mrb[56].mxu1 }
 0x631   :  { %v1791_v59 = vmul.f32 %v1737_v43, %v1695_v36  ;;  %v1623_v37 = vadd.f32 %v1622_v58, %v1484_v12  ;;  %v1624_v60 = vpop.f32.mrb[57].mxu1 }
 0x632   :  { %v1792_v61 = vmul.f32 %v1737_v43, %v1696_v52  ;;  %v1625_v6 = vadd.f32 %v1624_v60, %v1484_v12  ;;  %v1516_v52 = vpop.permute.xlu1 %1515 }
 0x633   :  { %v1818_v63 = vadd.f32 %v1817_v25, %v1791_v59  ;;  %v1697_v57 = vmax.f32 %v1623_v37, 0.0 }
 0x634   :  { %v1839_v2 = vadd.f32 %v1838_v55, %v1792_v61  ;;  %v1698_v40 = vmax.f32 %v1625_v6, 0.0  ;;  %v1628_v13 = vpop.f32.mrb[58].mxu1  ;;  %v1765_v61 = vpop.permute.xlu0 %1764 }
 0x635   :  { %v1793_v0 = vmul.f32 %v1741_v4, %v1697_v57  ;;  %v1629_v51 = vadd.f32 %v1628_v13, %v2920_v45  ;;  %v1630_v34 = vpop.f32.mrb[59].mxu1 }
 0x636   :  { %v1794_v42 = vmul.f32 %v1741_v4, %v1698_v40  ;;  %v1631_v17 = vadd.f32 %v1630_v34, %v2920_v45 }
 0x637   :  { %v1819_v18 = vadd.f32 %v1818_v63, %v1793_v0  ;;  %v1699_v19 = vmax.f32 %v1629_v51, 0.0 }
 0x638   :  { %v1840_v39 = vadd.f32 %v1839_v2, %v1794_v42  ;;  %v1700_v20 = vmax.f32 %v1631_v17, 0.0  ;;  %v1634_v43 = vpop.f32.mrb[60].mxu1 }
 0x639   :  { %v1795_v12 = vmul.f32 %v1745_v7, %v1699_v19  ;;  %v1635_v62 = vadd.f32 %v1634_v43, %v2922_v1  ;;  %v1636_v48 = vpop.f32.mrb[61].mxu1 }
 0x63a   :  { %v1796_v9 = vmul.f32 %v1745_v7, %v1700_v20  ;;  %v1637_v21 = vadd.f32 %v1636_v48, %v2922_v1  ;;  %v1769_v20 = vpop.permute.xlu0 %1768 }
 0x63b   :  { %v1820_v5 = vadd.f32 %v1819_v18, %v1795_v12  ;;  %v1701_v27 = vmax.f32 %v1635_v62, 0.0 }
 0x63c   :  { %v1841_v22 = vadd.f32 %v1840_v39, %v1796_v9  ;;  %v1702_v4 = vmax.f32 %v1637_v21, 0.0  ;;  %v1640_v15 = vpop.f32.mrb[62].mxu1 }
 0x63d   :  { %v1797_v45 = vmul.f32 %v1749_v53, %v1701_v27  ;;  %v1641_v44 = vadd.f32 %v1640_v15, %v2924_v33  ;;  %v1642_v49 = vpop.f32.mrb[63].mxu1 }
 0x63e   :  { %v1798_v14 = vmul.f32 %v1749_v53, %v1702_v4  ;;  %v1643_v28 = vadd.f32 %v1642_v49, %v2924_v33  ;;  %v1773_v49 = vpop.permute.xlu0 %1772 }
 0x63f   :  { %v1821_v29 = vadd.f32 %v1820_v5, %v1797_v45  ;;  %v1703_v11 = vmax.f32 %v1641_v44, 0.0 }
 0x640   :  { %v1842_v26 = vadd.f32 %v1841_v22, %v1798_v14  ;;  %v1704_v7 = vmax.f32 %v1643_v28, 0.0  ;;  %v1646_v30 = vpop.f32.mrb[64].mxu1 }
 0x641   :  { %v1799_v1 = vmul.f32 %v1753_v16, %v1703_v11  ;;  %v1647_v47 = vadd.f32 %v1646_v30, %v1500_v38  ;;  %v1648_v24 = vpop.f32.mrb[65].mxu1 }
 0x642   :  { %v1800_v32 = vmul.f32 %v1753_v16, %v1704_v7  ;;  %v1649_v56 = vadd.f32 %v1648_v24, %v1500_v38  ;;  %v1520_v16 = vpop.permute.xlu1 %1519 }
 0x643   :  { %v1822_v35 = vadd.f32 %v1821_v29, %v1799_v1  ;;  %v1705_v54 = vmax.f32 %v1647_v47, 0.0 }
 0x644   :  { %v1843_v10 = vadd.f32 %v1842_v26, %v1800_v32  ;;  %v1706_v25 = vmax.f32 %v1649_v56, 0.0  ;;  %v1652_v36 = vpop.f32.mrb[66].mxu1 }
 0x645   :  { %v1801_v53 = vmul.f32 %v1757_v8, %v1705_v54  ;;  %v1653_v55 = vadd.f32 %v1652_v36, %v1504_v3  ;;  %v1654_v33 = vpop.f32.mrb[67].mxu1 }
 0x646   :  { %v1802_v58 = vmul.f32 %v1757_v8, %v1706_v25  ;;  %v1655_v59 = vadd.f32 %v1654_v33, %v1504_v3  ;;  %v1524_v22 = vpop.permute.xlu1 %1523  ;;  %v1781_v33 = vpop.permute.xlu0 %1780 }
 0x647   :  { %v1823_v37 = vadd.f32 %v1822_v35, %v1801_v53  ;;  %v1707_v60 = vmax.f32 %v1653_v55, 0.0 }
 0x648   :  { %v1844_v6 = vadd.f32 %v1843_v10, %v1802_v58  ;;  %v1708_v63 = vmax.f32 %v1655_v59, 0.0  ;;  %v1658_v57 = vpop.f32.mrb[68].mxu1 }
 0x649   :  { %v1803_v2 = vmul.f32 %v1761_v31, %v1707_v60  ;;  %v1659_v40 = vadd.f32 %v1658_v57, %v1508_v41  ;;  %v1660_v38 = vpop.f32.mrb[69].mxu1 }
 0x64a   :  { %v1804_v13 = vmul.f32 %v1761_v31, %v1708_v63  ;;  %v1661_v0 = vadd.f32 %v1660_v38, %v1508_v41  ;;  %v1777_v1 = vpop.permute.xlu1 %1776  ;;  %v2169_v38 = vmov 1966171168  }
 0x64b   :  { %v1824_v51 = vadd.f32 %v1823_v37, %v1803_v2  ;;  %v1709_v34 = vmax.f32 %v1659_v40, 0.0 }
 0x64c   :  { %v1845_v42 = vadd.f32 %v1844_v6, %v1804_v13  ;;  %v1710_v17 = vmax.f32 %v1661_v0, 0.0  ;;  %v1664_v18 = vpop.f32.mrb[70].mxu1  ;;  %v1867_v13 = vunpack.c.l.s4 %v2169_v38 }
 0x64d   :  { %v1805_v19 = vmul.f32 %v1765_v61, %v1709_v34  ;;  %v1665_v39 = vadd.f32 %v1664_v18, %v1512_v23  ;;  %v1666_v3 = vpop.f32.mrb[71].mxu1 }
 0x64e   :  { %v1806_v43 = vmul.f32 %v1765_v61, %v1710_v17  ;;  %v1667_v12 = vadd.f32 %v1666_v3, %v1512_v23  ;;  %v1859_v17 = vpop.permute.xlu1 %1858 }
 0x64f   :  { %v1825_v62 = vadd.f32 %v1824_v51, %v1805_v19  ;;  %v1711_v48 = vmax.f32 %v1665_v39, 0.0 }
 0x650   :  { %v1846_v9 = vadd.f32 %v1845_v42, %v1806_v43  ;;  %v1712_v21 = vmax.f32 %v1667_v12, 0.0  ;;  %v1670_v5 = vpop.f32.mrb[72].mxu1  ;;  %v1868_v42 = vunpack.c.0.s8 %v1867_v13 }
 0x651   :  { %v1807_v27 = vmul.f32 %v1769_v20, %v1711_v48  ;;  %v1671_v8 = vadd.f32 %v1670_v5, %v1516_v52  ;;  %v1672_v41 = vpop.f32.mrb[73].mxu1 }
 0x652   :  { %v1808_v4 = vmul.f32 %v1769_v20, %v1712_v21  ;;  %v1673_v15 = vadd.f32 %v1672_v41, %v1516_v52  ;;  %v1871_v20 = vsub.s32 %v1868_v42, %v2529_v50 }
 0x653   :  { %v1826_v45 = vadd.f32 %v1825_v62, %v1807_v27  ;;  %v1713_v44 = vmax.f32 %v1671_v8, 0.0 }
 0x654   :  { %v1847_v14 = vadd.f32 %v1846_v9, %v1808_v4  ;;  %v1714_v28 = vmax.f32 %v1673_v15, 0.0  ;;  %v1676_v29 = vpop.f32.mrb[74].mxu1 }
 0x655   :  { %v1809_v11 = vmul.f32 %v1773_v49, %v1713_v44  ;;  %v1677_v26 = vadd.f32 %v1676_v29, %v1520_v16  ;;  %v1678_v23 = vpop.f32.mrb[75].mxu1 }
 0x656   :  { %v1810_v7 = vmul.f32 %v1773_v49, %v1714_v28  ;;  %v1679_v30 = vadd.f32 %v1678_v23, %v1520_v16 }
 0x657   :  { %v1827_v47 = vadd.f32 %v1826_v45, %v1809_v11  ;;  %v1715_v24 = vmax.f32 %v1677_v26, 0.0 }
 0x658   :  { %v1848_v31 = vadd.f32 %v1847_v14, %v1810_v7  ;;  %v1716_v32 = vmax.f32 %v1679_v30, 0.0  ;;  %v1682_v56 = vpop.f32.mrb[76].mxu1 }
 0x659   :  { %v1811_v35 = vmul.f32 %v1777_v1, %v1715_v24  ;;  %v1683_v54 = vadd.f32 %v1682_v56, %v1524_v22  ;;  %v1684_v10 = vpop.f32.mrb[77].mxu1 }
 0x65a   :  { %v1812_v25 = vmul.f32 %v1777_v1, %v1716_v32  ;;  %v1685_v36 = vadd.f32 %v1684_v10, %v1524_v22 }
 0x65b   :  { %v1828_v53 = vadd.f32 %v1827_v47, %v1811_v35  ;;  %v1717_v55 = vmax.f32 %v1683_v54, 0.0 }
 0x65c   :  { %v1849_v52 = vadd.f32 %v1848_v31, %v1812_v25  ;;  %v1718_v58 = vmax.f32 %v1685_v36, 0.0 }
 0x65d   :  { %v1813_v59 = vmul.f32 %v1781_v33, %v1717_v55 }
 0x65e   :  { %v1814_v37 = vmul.f32 %v1781_v33, %v1718_v58 }
 0x65f   :  { %v1829_v60 = vadd.f32 %v1828_v53, %v1813_v59 }
 0x660   :  { %v1850_v61 = vadd.f32 %v1849_v52, %v1814_v37 }
 0x661   :  { %v1830_v6 = vrot.slane %v1829_v60, 4 }
 0x662   :  { %v1851_v63 = vrot.slane %v1850_v61, 4 }
 0x663   :  { %v1831_v57 = vadd.f32 %v1830_v6, %v1829_v60 }
 0x664   :  { %v1852_v2 = vadd.f32 %v1851_v63, %v1850_v61 }
 0x665   :  { %v1832_v40 = vrot.slane %v1831_v57, 2 }
 0x666   :  { %v1853_v0 = vrot.slane %v1852_v2, 2 }
 0x667   :  { %v1833_v51 = vadd.f32 %v1832_v40, %v1831_v57 }
 0x668   :  { %v1854_v34 = vadd.f32 %v1853_v0, %v1852_v2 }
 0x669   :  { %v1834_v16 = vrot.slane %v1833_v51, 1 }
 0x66a   :  { %v1855_v18 = vrot.slane %v1854_v34, 1 }
 0x66b   :  { %v1835_v19 = vadd.f32 %v1834_v16, %v1833_v51 }
 0x66c   :  { %v1856_v39 = vadd.f32 %v1855_v18, %v1854_v34 }
 0x66d   :  { %v1861_v3 = vadd.f32 %v1859_v17, %v1835_v19 }
 0x66e   :  { %v1862_v43 = vadd.f32 %v1859_v17, %v1856_v39 }
 0x670   :  { %v1865_v12 = vcombine.low %v1861_v3, %v1862_v43 }
 0x672   :  { %v1872_v62 = vrot.slane %v1865_v12, %v1871_v20 }
 0x674   :  { %v1879_v48 = vrot.slane %v1872_v62, %v1871_v20 }
 0x676   :  { %1885 = vst.msk [vmem:[#allocation2] sm:$0x3] %vm1883_vm2, %v1879_v48 }
 0x677   :  { %2147 = shalt.err (!%p2144_p4)
}
 0x678   :  { %s2148_s1 = scalar_lea.hbm %s2951_s5, 32 }
 0x679   :  { %p2149_p5 = scmp.ne.s32.totalorder %s2951_s5, %s2148_s1  ;;  %p2152_p6 = scmp.lt.u32.totalorder %s2148_s1, %s2951_s5 }
 0x67b   :  { %p2154_p7 = pnand %p2152_p6, %p2149_p5 }
 0x67d   :  { %2157 = shalt.err (!%p2154_p7)
}
 0x67e   :  { %1895 = dma.vmem_to_hbm [thread:$0]  %s1893_s24, 32, %s2951_s5, [#allocation3]  }
 0x67f   :  { %2158 = dma.done.wait [#allocation3], 32  }
 0x680   :  { %2159 = vsyncadd [#allocation3], 4294967264 }
 0x681   :  { %1899 = vsyncpa [#allocation3], 1 }

</bundles_post_ra>
